<compile_context>
chip_gen: v7x
topology: tpu7x:2x2x1
jax: 0.10.0
libtpu: 0.0.40
codegen_flags: <defaults>
</compile_context>

<pallas_src>
import jax
import jax.numpy as jnp
from jax import lax
from jax.experimental import pallas as pl
from jax.experimental.pallas import tpu as pltpu

DP = 128   # per-gate lane width (hidden 60 padded to 128): lane-aligned gate slices


def _round_up(x, m):
    return (x + m - 1) // m * m


# ----------------------------------------------------------------------------
# Pallas kernel: masked GRU recurrence over characters of one word tile.
#   maxlen_ref : SMEM (num_tiles,) int32   per-tile max valid length (scalar prefetch)
#   ids_ref    : (Wb, C)        int32      char ids, word-major (chars on lanes)
#   len_ref    : (Wb, 1)        int32      valid length per word
#   ewi_ref    : (Vp, 3*DP)     bf16       emb @ [W_ir|W_iz|W_in] + input biases
#   wh_ref     : (DP, 3*DP)     bf16       [W_hr|W_hz|W_hn], rows/cols >= D are zero
#   bhn_ref    : (1, DP)        f32        b_hn (must stay inside the r * (...) term)
#   out_ref    : (Wb, DP)       f32        final hidden state (lanes >= D stay zero)
#   gi_ref     : (C, Wb, 3*DP)  bf16       VMEM scratch: gathered input projections
# ----------------------------------------------------------------------------
def char_gru_kernel(maxlen_ref, ids_ref, len_ref, ewi_ref, wh_ref, bhn_ref,
                    out_ref, gi_ref):
    bw, chars = ids_ref.shape
    dp = out_ref.shape[1]
    v_pad = ewi_ref.shape[0]

    # ---- Hoisted input-side work: gi[t] = EWi[ids[:, t]] --------------------
    # Row-gather implemented as a one-hot bf16 MXU matmul (exact row select, so
    # the bf16 store of the f32 accumulator is lossless).  Static trip count.
    ids = ids_ref[...]                                           # (bw, chars) int32
    ewi = ewi_ref[...]                                           # (v_pad, 3*dp) bf16
    iota_v = lax.broadcasted_iota(jnp.int32, (bw, v_pad), 1)
    for t in range(chars):
        onehot = (ids[:, t:t + 1] == iota_v).astype(jnp.bfloat16)   # (bw, v_pad)
        gi_ref[t] = jnp.dot(onehot, ewi,
                            preferred_element_type=jnp.float32).astype(jnp.bfloat16)

    # ---- Hoisted loads / broadcasts (kept out of the serial loop) -----------
    w_h = wh_ref[...]                                            # (dp, 3*dp) bf16
    bhn = jnp.broadcast_to(bhn_ref[...], (bw, dp))               # (bw, dp)  f32
    lens = jnp.broadcast_to(len_ref[...], (bw, dp))              # (bw, dp)  int32
    max_len = maxlen_ref[pl.program_id(0)]                       # scalar int32

    # ---- Serial masked GRU recurrence, bounded by the tile's max length. ----
    # fori_loop bounds live ranges (no register-file blowup) and skips the
    # fully-padded tail timesteps (they would be no-ops anyway).
    def step(t, h):
        g = gi_ref[t].astype(jnp.float32)                        # (bw, 3*dp)
        gh = jnp.dot(h.astype(jnp.bfloat16), w_h,
                     preferred_element_type=jnp.float32)         # (bw, 3*dp)
        r = jax.nn.sigmoid(g[:, 0:dp] + gh[:, 0:dp])
        z = jax.nn.sigmoid(g[:, dp:2 * dp] + gh[:, dp:2 * dp])
        n = jnp.tanh(g[:, 2 * dp:3 * dp] + r * (gh[:, 2 * dp:3 * dp] + bhn))
        h_new = n + z * (h - n)                                  # == (1-z)*n + z*h
        # packed-sequence emulation: padded steps keep the previous hidden state
        return jnp.where(t < lens, h_new, h)

    h0 = jnp.zeros((bw, dp), jnp.float32)
    out_ref[...] = lax.fori_loop(0, max_len, step, h0)


# ----------------------------------------------------------------------------
# Weight packing (shared with the reference so the correctness check is tight).
# ----------------------------------------------------------------------------
def _input_proj_tables(params):
    """EWi_g[v] = emb[v] @ W_ig + b_g, rounded to bf16 (what the kernel's
    one-hot row-select reproduces exactly)."""
    emb = params["embedding"]
    er = (jnp.dot(emb, params["wir"]) + params["br"]).astype(jnp.bfloat16)
    ez = (jnp.dot(emb, params["wiz"]) + params["bz"]).astype(jnp.bfloat16)
    en = (jnp.dot(emb, params["win"]) + params["bin"]).astype(jnp.bfloat16)
    return er, ez, en


def _pack_kernel_operands(params):
    emb = params["embedding"]
    V, D = emb.shape
    er, ez, en = _input_proj_tables(params)

    v_pad = _round_up(V, 128)
    ewi = jnp.zeros((v_pad, 3 * DP), jnp.bfloat16)
    ewi = ewi.at[:V, 0:D].set(er)
    ewi = ewi.at[:V, DP:DP + D].set(ez)
    ewi = ewi.at[:V, 2 * DP:2 * DP + D].set(en)

    w_h = jnp.zeros((DP, 3 * DP), jnp.float32)
    w_h = w_h.at[:D, 0:D].set(params["whr"])
    w_h = w_h.at[:D, DP:DP + D].set(params["whz"])
    w_h = w_h.at[:D, 2 * DP:2 * DP + D].set(params["whn"])

    b_hn = jnp.zeros((1, DP), jnp.float32).at[:, 0:D].set(params["bhn"])
    return ewi, w_h.astype(jnp.bfloat16), b_hn


# ----------------------------------------------------------------------------
# Wrapper: tiling, padding, scalar-prefetched per-tile max length, pallas_call.
# ----------------------------------------------------------------------------
@jax.jit
def char_embedding_forward(x_ids, mask, params):
    emb = params["embedding"]
    words, chars = x_ids.shape
    D = emb.shape[1]

    lengths = jnp.sum(mask.astype(jnp.int32), axis=1)            # (words,)

    # Word-tile size: <= 128 rows (keeps the per-step f32 working set near the
    # 64-vreg file) and ~words/2 so larger batches give >= 2 grid steps for the
    # "parallel" words axis to shard across v7x's two TensorCores.
    block_w = min(_round_up(max((words + 1) // 2, 1), 8), 128)
    words_pad = _round_up(words, block_w)
    num_tiles = words_pad // block_w

    ids = x_ids.astype(jnp.int32)
    if words_pad != words:
        # padded rows: id 0 / length 0 -> h stays exactly 0 in the kernel
        ids = jnp.pad(ids, ((0, words_pad - words), (0, 0)))
        lengths = jnp.pad(lengths, (0, words_pad - words))
    lens2d = lengths[:, None].astype(jnp.int32)                  # (words_pad, 1)

    # Per-tile max valid length -> bounds the serial recurrence (scalar prefetch).
    tile_maxlen = jnp.max(lengths.reshape(num_tiles, block_w), axis=1).astype(jnp.int32)

    ewi, w_h, b_hn = _pack_kernel_operands(params)
    v_pad = ewi.shape[0]

    out = pl.pallas_call(
        char_gru_kernel,
        out_shape=jax.ShapeDtypeStruct((words_pad, DP), jnp.float32),
        grid_spec=pltpu.PrefetchScalarGridSpec(
            num_scalar_prefetch=1,
            grid=(num_tiles,),
            in_specs=[
                pl.BlockSpec((block_w, chars), lambda i, ml: (i, 0)),     # ids
                pl.BlockSpec((block_w, 1), lambda i, ml: (i, 0)),         # lengths
                pl.BlockSpec((v_pad, 3 * DP), lambda i, ml: (0, 0)),      # EWi table
                pl.BlockSpec((DP, 3 * DP), lambda i, ml: (0, 0)),         # W_h packed
                pl.BlockSpec((1, DP), lambda i, ml: (0, 0)),              # b_hn
            ],
            out_specs=pl.BlockSpec((block_w, DP), lambda i, ml: (i, 0)),
            scratch_shapes=[pltpu.VMEM((chars, block_w, 3 * DP), jnp.bfloat16)],
        ),
        compiler_params=pltpu.CompilerParams(
            dimension_semantics=("parallel",),
            # Explicit scoped-VMEM budget (actual use ~2.5 MiB at chars=16,
            # block_w=128); 32 MiB is within physical VMEM on v5e/v6e/v7x.
            vmem_limit_bytes=32 * 1024 * 1024,
        ),
    )(tile_maxlen, ids, lens2d, ewi, w_h, b_hn)

    return out[:words, :D]


# ----------------------------------------------------------------------------
# Deterministic parameter construction (shapes per nn.Embedding / nn.GRU).
# ----------------------------------------------------------------------------
def init_params(key, vocab_size, embedding_dim):
    D = embedding_dim
    k_emb, k_wih, k_whh, k_bih, k_bhh = jax.random.split(key, 5)

    # nn.Embedding(num_embeddings=V, embedding_dim=D, padding_idx=0)
    emb = jax.random.normal(k_emb, (vocab_size, D), jnp.float32)
    emb = emb.at[0].set(0.0)

    # nn.GRU(D, D): weight_ih_l0 (3D, D), weight_hh_l0 (3D, D), biases (3D,),
    # uniform(-1/sqrt(D), 1/sqrt(D)); gate order r, z, n.
    bound = 1.0 / jnp.sqrt(jnp.float32(D))
    w_ih = jax.random.uniform(k_wih, (3 * D, D), jnp.float32, -bound, bound)
    w_hh = jax.random.uniform(k_whh, (3 * D, D), jnp.float32, -bound, bound)
    b_ih = jax.random.uniform(k_bih, (3 * D,), jnp.float32, -bound, bound)
    b_hh = jax.random.uniform(k_bhh, (3 * D,), jnp.float32, -bound, bound)

    wir, wiz, win = (w_ih[0:D].T, w_ih[D:2 * D].T, w_ih[2 * D:].T)   # (D, D) each
    whr, whz, whn = (w_hh[0:D].T, w_hh[D:2 * D].T, w_hh[2 * D:].T)   # (D, D) each
    b_r = (b_ih[0:D] + b_hh[0:D]).reshape(1, D)
    b_z = (b_ih[D:2 * D] + b_hh[D:2 * D]).reshape(1, D)
    b_in = b_ih[2 * D:].reshape(1, D)
    b_hn = b_hh[2 * D:].reshape(1, D)

    return {
        "embedding": emb,
        "wir": wir, "wiz": wiz, "win": win,
        "whr": whr, "whz": whz, "whn": whn,
        "br": b_r, "bz": b_z, "bin": b_in, "bhn": b_hn,
    }


# ----------------------------------------------------------------------------
# Pure-JAX reference of the same forward.  Mirrors the kernel's two rounding
# points (bf16 EWi table, bf16 h before each hidden matmul, f32 accumulation)
# so the correctness check is tight.
# ----------------------------------------------------------------------------
def reference_forward(x_ids, mask, p):
    words, chars = x_ids.shape
    er, ez, en = _input_proj_tables(p)                            # (V, D) bf16 each
    gr = er[x_ids].astype(jnp.float32)                            # (W, C, D)
    gz = ez[x_ids].astype(jnp.float32)
    gn = en[x_ids].astype(jnp.float32)

    def dotf(a, b):
        return jnp.dot(a.astype(jnp.bfloat16), b.astype(jnp.bfloat16),
                       preferred_element_type=jnp.float32)

    D = p["embedding"].shape[1]
    h = jnp.zeros((words, D), jnp.float32)
    for t in range(chars):
        r = jax.nn.sigmoid(gr[:, t] + dotf(h, p["whr"]))
        z = jax.nn.sigmoid(gz[:, t] + dotf(h, p["whz"]))
        n = jnp.tanh(gn[:, t] + r * (dotf(h, p["whn"]) + p["bhn"]))
        h_new = (1.0 - z) * n + z * h
        valid = mask[:, t].astype(bool)[:, None]
        h = jnp.where(valid, h_new, h)
    return h


if __name__ == "__main__":
    WORDS, CHARS = 8, 16           # batch of 8 "words", up to 16 chars each
    VOCAB, EMB_DIM = 30, 60        # lexicon size 30, embedding_dim=60 (module default)

    key = jax.random.PRNGKey(0)
    k_params, k_ids = jax.random.split(key)
    params = init_params(k_params, VOCAB, EMB_DIM)

    # Deterministic inputs: right-padded char-id sequences + validity mask.
    lengths = jnp.array([16, 5, 1, 8, 12, 3, 16, 7], dtype=jnp.int32)
    pos = jnp.arange(CHARS, dtype=jnp.int32)[None, :]
    mask = (pos < lengths[:, None]).astype(jnp.int32)             # (WORDS, CHARS)
    raw_ids = jax.random.randint(k_ids, (WORDS, CHARS), 1, VOCAB, jnp.int32)
    x_ids = raw_ids * mask                                        # padding char id = 0

    out = jax.block_until_ready(char_embedding_forward(x_ids, mask, params))
    ref = reference_forward(x_ids, mask, params)

    assert out.shape == (WORDS, EMB_DIM)
    # Kernel and reference share the bf16 EWi table and bf16-MXU/f32-acc hidden
    # matmuls; residual diffs are f32 accumulation-order noise.
    assert jnp.max(jnp.abs(out - ref)) < 1e-2, "mismatch vs reference"

    print("KERNEL_OK")
</pallas_src>

<mosaic_0001>
module attributes {stable_mosaic.version = 11 : i64} {
  func.func @char_gru_kernel(%arg0: i32, %arg1: memref<1xi32, #tpu.memory_space<smem>>, %arg2: memref<8x16xi32, #tpu.memory_space<vmem>>, %arg3: memref<8x1xi32, #tpu.memory_space<vmem>>, %arg4: memref<128x384xbf16, #tpu.memory_space<vmem>>, %arg5: memref<128x384xbf16, #tpu.memory_space<vmem>>, %arg6: memref<1x128xf32, #tpu.memory_space<vmem>>, %arg7: memref<8x128xf32, #tpu.memory_space<vmem>>, %arg8: memref<16x8x384xbf16, #tpu.memory_space<vmem>>) attributes {dimension_semantics = [#tpu.dimension_semantics<parallel>], iteration_bounds = array<i64: 1>, scalar_prefetch = 1 : i64, scratch_operands = 1 : i64, tpu.core_type = #tpu.core_type<tc>, window_params = [{transform_indices = @transform_0, window_bounds = array<i64: 8, 16>}, {transform_indices = @transform_1, window_bounds = array<i64: 8, 1>}, {pipeline_mode = #tpu.pipeline_mode<synchronous>, transform_indices = @transform_2, window_bounds = array<i64: 128, 384>}, {pipeline_mode = #tpu.pipeline_mode<synchronous>, transform_indices = @transform_3, window_bounds = array<i64: 128, 384>}, {pipeline_mode = #tpu.pipeline_mode<synchronous>, transform_indices = @transform_4, window_bounds = array<i64: 1, 128>}, {transform_indices = @transform_5, window_bounds = array<i64: 8, 128>}]} {
    %c0 = arith.constant 0 : index
    %c0_0 = arith.constant 0 : index
    %0 = vector.load %arg2[%c0, %c0_0] : memref<8x16xi32, #tpu.memory_space<vmem>>, vector<8x16xi32>
    %c0_1 = arith.constant 0 : index
    %c0_2 = arith.constant 0 : index
    %1 = vector.load %arg4[%c0_1, %c0_2] : memref<128x384xbf16, #tpu.memory_space<vmem>>, vector<128x384xbf16>
    %2 = tpu.iota {dimensions = array<i32: 1>} : vector<8x128xi32>
    %3 = vector.extract_strided_slice %0 {offsets = [0, 0], sizes = [8, 1], strides = [1, 1]} : vector<8x16xi32> to vector<8x1xi32>
    %4 = vector.broadcast %3 : vector<8x1xi32> to vector<8x128xi32>
    %5 = arith.cmpi eq, %4, %2 : vector<8x128xi32>
    %6 = arith.extui %5 : vector<8x128xi1> to vector<8x128xi32>
    %7 = arith.sitofp %6 : vector<8x128xi32> to vector<8x128xf32>
    %8 = arith.truncf %7 : vector<8x128xf32> to vector<8x128xbf16>
    %cst = arith.constant dense<0.000000e+00> : vector<8x384xf32>
    %9 = tpu.matmul %8, %1, %cst {dimension_numbers = #tpu.dot_dimension_numbers<[1], [0], [0], [1], [0, 0, 1, 1], [], []>} : vector<8x128xbf16>, vector<128x384xbf16>, vector<8x384xf32> -> vector<8x384xf32>
    %10 = arith.truncf %9 : vector<8x384xf32> to vector<8x384xbf16>
    %c0_3 = arith.constant 0 : index
    %c0_4 = arith.constant 0 : index
    %c0_5 = arith.constant 0 : index
    %11 = vector.load %arg8[%c0_3, %c0_4, %c0_5] : memref<16x8x384xbf16, #tpu.memory_space<vmem>>, vector<1x8x384xbf16>
    %12 = vector.shape_cast %11 : vector<1x8x384xbf16> to vector<8x384xbf16>
    %13 = vector.shape_cast %10 : vector<8x384xbf16> to vector<1x8x384xbf16>
    tpu.vector_store %arg8[%c0_3, %c0_4, %c0_5], %13 {strides = array<i32>} : memref<16x8x384xbf16, #tpu.memory_space<vmem>>, vector<1x8x384xbf16>,
    %14 = vector.extract_strided_slice %0 {offsets = [0, 1], sizes = [8, 1], strides = [1, 1]} : vector<8x16xi32> to vector<8x1xi32>
    %15 = vector.broadcast %14 : vector<8x1xi32> to vector<8x128xi32>
    %16 = arith.cmpi eq, %15, %2 : vector<8x128xi32>
    %17 = arith.extui %16 : vector<8x128xi1> to vector<8x128xi32>
    %18 = arith.sitofp %17 : vector<8x128xi32> to vector<8x128xf32>
    %19 = arith.truncf %18 : vector<8x128xf32> to vector<8x128xbf16>
    %cst_6 = arith.constant dense<0.000000e+00> : vector<8x384xf32>
    %20 = tpu.matmul %19, %1, %cst_6 {dimension_numbers = #tpu.dot_dimension_numbers<[1], [0], [0], [1], [0, 0, 1, 1], [], []>} : vector<8x128xbf16>, vector<128x384xbf16>, vector<8x384xf32> -> vector<8x384xf32>
    %21 = arith.truncf %20 : vector<8x384xf32> to vector<8x384xbf16>
    %c1 = arith.constant 1 : index
    %c0_7 = arith.constant 0 : index
    %c0_8 = arith.constant 0 : index
    %22 = vector.load %arg8[%c1, %c0_7, %c0_8] : memref<16x8x384xbf16, #tpu.memory_space<vmem>>, vector<1x8x384xbf16>
    %23 = vector.shape_cast %22 : vector<1x8x384xbf16> to vector<8x384xbf16>
    %24 = vector.shape_cast %21 : vector<8x384xbf16> to vector<1x8x384xbf16>
    tpu.vector_store %arg8[%c1, %c0_7, %c0_8], %24 {strides = array<i32>} : memref<16x8x384xbf16, #tpu.memory_space<vmem>>, vector<1x8x384xbf16>,
    %25 = vector.extract_strided_slice %0 {offsets = [0, 2], sizes = [8, 1], strides = [1, 1]} : vector<8x16xi32> to vector<8x1xi32>
    %26 = vector.broadcast %25 : vector<8x1xi32> to vector<8x128xi32>
    %27 = arith.cmpi eq, %26, %2 : vector<8x128xi32>
    %28 = arith.extui %27 : vector<8x128xi1> to vector<8x128xi32>
    %29 = arith.sitofp %28 : vector<8x128xi32> to vector<8x128xf32>
    %30 = arith.truncf %29 : vector<8x128xf32> to vector<8x128xbf16>
    %cst_9 = arith.constant dense<0.000000e+00> : vector<8x384xf32>
    %31 = tpu.matmul %30, %1, %cst_9 {dimension_numbers = #tpu.dot_dimension_numbers<[1], [0], [0], [1], [0, 0, 1, 1], [], []>} : vector<8x128xbf16>, vector<128x384xbf16>, vector<8x384xf32> -> vector<8x384xf32>
    %32 = arith.truncf %31 : vector<8x384xf32> to vector<8x384xbf16>
    %c2 = arith.constant 2 : index
    %c0_10 = arith.constant 0 : index
    %c0_11 = arith.constant 0 : index
    %33 = vector.load %arg8[%c2, %c0_10, %c0_11] : memref<16x8x384xbf16, #tpu.memory_space<vmem>>, vector<1x8x384xbf16>
    %34 = vector.shape_cast %33 : vector<1x8x384xbf16> to vector<8x384xbf16>
    %35 = vector.shape_cast %32 : vector<8x384xbf16> to vector<1x8x384xbf16>
    tpu.vector_store %arg8[%c2, %c0_10, %c0_11], %35 {strides = array<i32>} : memref<16x8x384xbf16, #tpu.memory_space<vmem>>, vector<1x8x384xbf16>,
    %36 = vector.extract_strided_slice %0 {offsets = [0, 3], sizes = [8, 1], strides = [1, 1]} : vector<8x16xi32> to vector<8x1xi32>
    %37 = vector.broadcast %36 : vector<8x1xi32> to vector<8x128xi32>
    %38 = arith.cmpi eq, %37, %2 : vector<8x128xi32>
    %39 = arith.extui %38 : vector<8x128xi1> to vector<8x128xi32>
    %40 = arith.sitofp %39 : vector<8x128xi32> to vector<8x128xf32>
    %41 = arith.truncf %40 : vector<8x128xf32> to vector<8x128xbf16>
    %cst_12 = arith.constant dense<0.000000e+00> : vector<8x384xf32>
    %42 = tpu.matmul %41, %1, %cst_12 {dimension_numbers = #tpu.dot_dimension_numbers<[1], [0], [0], [1], [0, 0, 1, 1], [], []>} : vector<8x128xbf16>, vector<128x384xbf16>, vector<8x384xf32> -> vector<8x384xf32>
    %43 = arith.truncf %42 : vector<8x384xf32> to vector<8x384xbf16>
    %c3 = arith.constant 3 : index
    %c0_13 = arith.constant 0 : index
    %c0_14 = arith.constant 0 : index
    %44 = vector.load %arg8[%c3, %c0_13, %c0_14] : memref<16x8x384xbf16, #tpu.memory_space<vmem>>, vector<1x8x384xbf16>
    %45 = vector.shape_cast %44 : vector<1x8x384xbf16> to vector<8x384xbf16>
    %46 = vector.shape_cast %43 : vector<8x384xbf16> to vector<1x8x384xbf16>
    tpu.vector_store %arg8[%c3, %c0_13, %c0_14], %46 {strides = array<i32>} : memref<16x8x384xbf16, #tpu.memory_space<vmem>>, vector<1x8x384xbf16>,
    %47 = vector.extract_strided_slice %0 {offsets = [0, 4], sizes = [8, 1], strides = [1, 1]} : vector<8x16xi32> to vector<8x1xi32>
    %48 = vector.broadcast %47 : vector<8x1xi32> to vector<8x128xi32>
    %49 = arith.cmpi eq, %48, %2 : vector<8x128xi32>
    %50 = arith.extui %49 : vector<8x128xi1> to vector<8x128xi32>
    %51 = arith.sitofp %50 : vector<8x128xi32> to vector<8x128xf32>
    %52 = arith.truncf %51 : vector<8x128xf32> to vector<8x128xbf16>
    %cst_15 = arith.constant dense<0.000000e+00> : vector<8x384xf32>
    %53 = tpu.matmul %52, %1, %cst_15 {dimension_numbers = #tpu.dot_dimension_numbers<[1], [0], [0], [1], [0, 0, 1, 1], [], []>} : vector<8x128xbf16>, vector<128x384xbf16>, vector<8x384xf32> -> vector<8x384xf32>
    %54 = arith.truncf %53 : vector<8x384xf32> to vector<8x384xbf16>
    %c4 = arith.constant 4 : index
    %c0_16 = arith.constant 0 : index
    %c0_17 = arith.constant 0 : index
    %55 = vector.load %arg8[%c4, %c0_16, %c0_17] : memref<16x8x384xbf16, #tpu.memory_space<vmem>>, vector<1x8x384xbf16>
    %56 = vector.shape_cast %55 : vector<1x8x384xbf16> to vector<8x384xbf16>
    %57 = vector.shape_cast %54 : vector<8x384xbf16> to vector<1x8x384xbf16>
    tpu.vector_store %arg8[%c4, %c0_16, %c0_17], %57 {strides = array<i32>} : memref<16x8x384xbf16, #tpu.memory_space<vmem>>, vector<1x8x384xbf16>,
    %58 = vector.extract_strided_slice %0 {offsets = [0, 5], sizes = [8, 1], strides = [1, 1]} : vector<8x16xi32> to vector<8x1xi32>
    %59 = vector.broadcast %58 : vector<8x1xi32> to vector<8x128xi32>
    %60 = arith.cmpi eq, %59, %2 : vector<8x128xi32>
    %61 = arith.extui %60 : vector<8x128xi1> to vector<8x128xi32>
    %62 = arith.sitofp %61 : vector<8x128xi32> to vector<8x128xf32>
    %63 = arith.truncf %62 : vector<8x128xf32> to vector<8x128xbf16>
    %cst_18 = arith.constant dense<0.000000e+00> : vector<8x384xf32>
    %64 = tpu.matmul %63, %1, %cst_18 {dimension_numbers = #tpu.dot_dimension_numbers<[1], [0], [0], [1], [0, 0, 1, 1], [], []>} : vector<8x128xbf16>, vector<128x384xbf16>, vector<8x384xf32> -> vector<8x384xf32>
    %65 = arith.truncf %64 : vector<8x384xf32> to vector<8x384xbf16>
    %c5 = arith.constant 5 : index
    %c0_19 = arith.constant 0 : index
    %c0_20 = arith.constant 0 : index
    %66 = vector.load %arg8[%c5, %c0_19, %c0_20] : memref<16x8x384xbf16, #tpu.memory_space<vmem>>, vector<1x8x384xbf16>
    %67 = vector.shape_cast %66 : vector<1x8x384xbf16> to vector<8x384xbf16>
    %68 = vector.shape_cast %65 : vector<8x384xbf16> to vector<1x8x384xbf16>
    tpu.vector_store %arg8[%c5, %c0_19, %c0_20], %68 {strides = array<i32>} : memref<16x8x384xbf16, #tpu.memory_space<vmem>>, vector<1x8x384xbf16>,
    %69 = vector.extract_strided_slice %0 {offsets = [0, 6], sizes = [8, 1], strides = [1, 1]} : vector<8x16xi32> to vector<8x1xi32>
    %70 = vector.broadcast %69 : vector<8x1xi32> to vector<8x128xi32>
    %71 = arith.cmpi eq, %70, %2 : vector<8x128xi32>
    %72 = arith.extui %71 : vector<8x128xi1> to vector<8x128xi32>
    %73 = arith.sitofp %72 : vector<8x128xi32> to vector<8x128xf32>
    %74 = arith.truncf %73 : vector<8x128xf32> to vector<8x128xbf16>
    %cst_21 = arith.constant dense<0.000000e+00> : vector<8x384xf32>
    %75 = tpu.matmul %74, %1, %cst_21 {dimension_numbers = #tpu.dot_dimension_numbers<[1], [0], [0], [1], [0, 0, 1, 1], [], []>} : vector<8x128xbf16>, vector<128x384xbf16>, vector<8x384xf32> -> vector<8x384xf32>
    %76 = arith.truncf %75 : vector<8x384xf32> to vector<8x384xbf16>
    %c6 = arith.constant 6 : index
    %c0_22 = arith.constant 0 : index
    %c0_23 = arith.constant 0 : index
    %77 = vector.load %arg8[%c6, %c0_22, %c0_23] : memref<16x8x384xbf16, #tpu.memory_space<vmem>>, vector<1x8x384xbf16>
    %78 = vector.shape_cast %77 : vector<1x8x384xbf16> to vector<8x384xbf16>
    %79 = vector.shape_cast %76 : vector<8x384xbf16> to vector<1x8x384xbf16>
    tpu.vector_store %arg8[%c6, %c0_22, %c0_23], %79 {strides = array<i32>} : memref<16x8x384xbf16, #tpu.memory_space<vmem>>, vector<1x8x384xbf16>,
    %80 = vector.extract_strided_slice %0 {offsets = [0, 7], sizes = [8, 1], strides = [1, 1]} : vector<8x16xi32> to vector<8x1xi32>
    %81 = vector.broadcast %80 : vector<8x1xi32> to vector<8x128xi32>
    %82 = arith.cmpi eq, %81, %2 : vector<8x128xi32>
    %83 = arith.extui %82 : vector<8x128xi1> to vector<8x128xi32>
    %84 = arith.sitofp %83 : vector<8x128xi32> to vector<8x128xf32>
    %85 = arith.truncf %84 : vector<8x128xf32> to vector<8x128xbf16>
    %cst_24 = arith.constant dense<0.000000e+00> : vector<8x384xf32>
    %86 = tpu.matmul %85, %1, %cst_24 {dimension_numbers = #tpu.dot_dimension_numbers<[1], [0], [0], [1], [0, 0, 1, 1], [], []>} : vector<8x128xbf16>, vector<128x384xbf16>, vector<8x384xf32> -> vector<8x384xf32>
    %87 = arith.truncf %86 : vector<8x384xf32> to vector<8x384xbf16>
    %c7 = arith.constant 7 : index
    %c0_25 = arith.constant 0 : index
    %c0_26 = arith.constant 0 : index
    %88 = vector.load %arg8[%c7, %c0_25, %c0_26] : memref<16x8x384xbf16, #tpu.memory_space<vmem>>, vector<1x8x384xbf16>
    %89 = vector.shape_cast %88 : vector<1x8x384xbf16> to vector<8x384xbf16>
    %90 = vector.shape_cast %87 : vector<8x384xbf16> to vector<1x8x384xbf16>
    tpu.vector_store %arg8[%c7, %c0_25, %c0_26], %90 {strides = array<i32>} : memref<16x8x384xbf16, #tpu.memory_space<vmem>>, vector<1x8x384xbf16>,
    %91 = vector.extract_strided_slice %0 {offsets = [0, 8], sizes = [8, 1], strides = [1, 1]} : vector<8x16xi32> to vector<8x1xi32>
    %92 = vector.broadcast %91 : vector<8x1xi32> to vector<8x128xi32>
    %93 = arith.cmpi eq, %92, %2 : vector<8x128xi32>
    %94 = arith.extui %93 : vector<8x128xi1> to vector<8x128xi32>
    %95 = arith.sitofp %94 : vector<8x128xi32> to vector<8x128xf32>
    %96 = arith.truncf %95 : vector<8x128xf32> to vector<8x128xbf16>
    %cst_27 = arith.constant dense<0.000000e+00> : vector<8x384xf32>
    %97 = tpu.matmul %96, %1, %cst_27 {dimension_numbers = #tpu.dot_dimension_numbers<[1], [0], [0], [1], [0, 0, 1, 1], [], []>} : vector<8x128xbf16>, vector<128x384xbf16>, vector<8x384xf32> -> vector<8x384xf32>
    %98 = arith.truncf %97 : vector<8x384xf32> to vector<8x384xbf16>
    %c8 = arith.constant 8 : index
    %c0_28 = arith.constant 0 : index
    %c0_29 = arith.constant 0 : index
    %99 = vector.load %arg8[%c8, %c0_28, %c0_29] : memref<16x8x384xbf16, #tpu.memory_space<vmem>>, vector<1x8x384xbf16>
    %100 = vector.shape_cast %99 : vector<1x8x384xbf16> to vector<8x384xbf16>
    %101 = vector.shape_cast %98 : vector<8x384xbf16> to vector<1x8x384xbf16>
    tpu.vector_store %arg8[%c8, %c0_28, %c0_29], %101 {strides = array<i32>} : memref<16x8x384xbf16, #tpu.memory_space<vmem>>, vector<1x8x384xbf16>,
    %102 = vector.extract_strided_slice %0 {offsets = [0, 9], sizes = [8, 1], strides = [1, 1]} : vector<8x16xi32> to vector<8x1xi32>
    %103 = vector.broadcast %102 : vector<8x1xi32> to vector<8x128xi32>
    %104 = arith.cmpi eq, %103, %2 : vector<8x128xi32>
    %105 = arith.extui %104 : vector<8x128xi1> to vector<8x128xi32>
    %106 = arith.sitofp %105 : vector<8x128xi32> to vector<8x128xf32>
    %107 = arith.truncf %106 : vector<8x128xf32> to vector<8x128xbf16>
    %cst_30 = arith.constant dense<0.000000e+00> : vector<8x384xf32>
    %108 = tpu.matmul %107, %1, %cst_30 {dimension_numbers = #tpu.dot_dimension_numbers<[1], [0], [0], [1], [0, 0, 1, 1], [], []>} : vector<8x128xbf16>, vector<128x384xbf16>, vector<8x384xf32> -> vector<8x384xf32>
    %109 = arith.truncf %108 : vector<8x384xf32> to vector<8x384xbf16>
    %c9 = arith.constant 9 : index
    %c0_31 = arith.constant 0 : index
    %c0_32 = arith.constant 0 : index
    %110 = vector.load %arg8[%c9, %c0_31, %c0_32] : memref<16x8x384xbf16, #tpu.memory_space<vmem>>, vector<1x8x384xbf16>
    %111 = vector.shape_cast %110 : vector<1x8x384xbf16> to vector<8x384xbf16>
    %112 = vector.shape_cast %109 : vector<8x384xbf16> to vector<1x8x384xbf16>
    tpu.vector_store %arg8[%c9, %c0_31, %c0_32], %112 {strides = array<i32>} : memref<16x8x384xbf16, #tpu.memory_space<vmem>>, vector<1x8x384xbf16>,
    %113 = vector.extract_strided_slice %0 {offsets = [0, 10], sizes = [8, 1], strides = [1, 1]} : vector<8x16xi32> to vector<8x1xi32>
    %114 = vector.broadcast %113 : vector<8x1xi32> to vector<8x128xi32>
    %115 = arith.cmpi eq, %114, %2 : vector<8x128xi32>
    %116 = arith.extui %115 : vector<8x128xi1> to vector<8x128xi32>
    %117 = arith.sitofp %116 : vector<8x128xi32> to vector<8x128xf32>
    %118 = arith.truncf %117 : vector<8x128xf32> to vector<8x128xbf16>
    %cst_33 = arith.constant dense<0.000000e+00> : vector<8x384xf32>
    %119 = tpu.matmul %118, %1, %cst_33 {dimension_numbers = #tpu.dot_dimension_numbers<[1], [0], [0], [1], [0, 0, 1, 1], [], []>} : vector<8x128xbf16>, vector<128x384xbf16>, vector<8x384xf32> -> vector<8x384xf32>
    %120 = arith.truncf %119 : vector<8x384xf32> to vector<8x384xbf16>
    %c10 = arith.constant 10 : index
    %c0_34 = arith.constant 0 : index
    %c0_35 = arith.constant 0 : index
    %121 = vector.load %arg8[%c10, %c0_34, %c0_35] : memref<16x8x384xbf16, #tpu.memory_space<vmem>>, vector<1x8x384xbf16>
    %122 = vector.shape_cast %121 : vector<1x8x384xbf16> to vector<8x384xbf16>
    %123 = vector.shape_cast %120 : vector<8x384xbf16> to vector<1x8x384xbf16>
    tpu.vector_store %arg8[%c10, %c0_34, %c0_35], %123 {strides = array<i32>} : memref<16x8x384xbf16, #tpu.memory_space<vmem>>, vector<1x8x384xbf16>,
    %124 = vector.extract_strided_slice %0 {offsets = [0, 11], sizes = [8, 1], strides = [1, 1]} : vector<8x16xi32> to vector<8x1xi32>
    %125 = vector.broadcast %124 : vector<8x1xi32> to vector<8x128xi32>
    %126 = arith.cmpi eq, %125, %2 : vector<8x128xi32>
    %127 = arith.extui %126 : vector<8x128xi1> to vector<8x128xi32>
    %128 = arith.sitofp %127 : vector<8x128xi32> to vector<8x128xf32>
    %129 = arith.truncf %128 : vector<8x128xf32> to vector<8x128xbf16>
    %cst_36 = arith.constant dense<0.000000e+00> : vector<8x384xf32>
    %130 = tpu.matmul %129, %1, %cst_36 {dimension_numbers = #tpu.dot_dimension_numbers<[1], [0], [0], [1], [0, 0, 1, 1], [], []>} : vector<8x128xbf16>, vector<128x384xbf16>, vector<8x384xf32> -> vector<8x384xf32>
    %131 = arith.truncf %130 : vector<8x384xf32> to vector<8x384xbf16>
    %c11 = arith.constant 11 : index
    %c0_37 = arith.constant 0 : index
    %c0_38 = arith.constant 0 : index
    %132 = vector.load %arg8[%c11, %c0_37, %c0_38] : memref<16x8x384xbf16, #tpu.memory_space<vmem>>, vector<1x8x384xbf16>
    %133 = vector.shape_cast %132 : vector<1x8x384xbf16> to vector<8x384xbf16>
    %134 = vector.shape_cast %131 : vector<8x384xbf16> to vector<1x8x384xbf16>
    tpu.vector_store %arg8[%c11, %c0_37, %c0_38], %134 {strides = array<i32>} : memref<16x8x384xbf16, #tpu.memory_space<vmem>>, vector<1x8x384xbf16>,
    %135 = vector.extract_strided_slice %0 {offsets = [0, 12], sizes = [8, 1], strides = [1, 1]} : vector<8x16xi32> to vector<8x1xi32>
    %136 = vector.broadcast %135 : vector<8x1xi32> to vector<8x128xi32>
    %137 = arith.cmpi eq, %136, %2 : vector<8x128xi32>
    %138 = arith.extui %137 : vector<8x128xi1> to vector<8x128xi32>
    %139 = arith.sitofp %138 : vector<8x128xi32> to vector<8x128xf32>
    %140 = arith.truncf %139 : vector<8x128xf32> to vector<8x128xbf16>
    %cst_39 = arith.constant dense<0.000000e+00> : vector<8x384xf32>
    %141 = tpu.matmul %140, %1, %cst_39 {dimension_numbers = #tpu.dot_dimension_numbers<[1], [0], [0], [1], [0, 0, 1, 1], [], []>} : vector<8x128xbf16>, vector<128x384xbf16>, vector<8x384xf32> -> vector<8x384xf32>
    %142 = arith.truncf %141 : vector<8x384xf32> to vector<8x384xbf16>
    %c12 = arith.constant 12 : index
    %c0_40 = arith.constant 0 : index
    %c0_41 = arith.constant 0 : index
    %143 = vector.load %arg8[%c12, %c0_40, %c0_41] : memref<16x8x384xbf16, #tpu.memory_space<vmem>>, vector<1x8x384xbf16>
    %144 = vector.shape_cast %143 : vector<1x8x384xbf16> to vector<8x384xbf16>
    %145 = vector.shape_cast %142 : vector<8x384xbf16> to vector<1x8x384xbf16>
    tpu.vector_store %arg8[%c12, %c0_40, %c0_41], %145 {strides = array<i32>} : memref<16x8x384xbf16, #tpu.memory_space<vmem>>, vector<1x8x384xbf16>,
    %146 = vector.extract_strided_slice %0 {offsets = [0, 13], sizes = [8, 1], strides = [1, 1]} : vector<8x16xi32> to vector<8x1xi32>
    %147 = vector.broadcast %146 : vector<8x1xi32> to vector<8x128xi32>
    %148 = arith.cmpi eq, %147, %2 : vector<8x128xi32>
    %149 = arith.extui %148 : vector<8x128xi1> to vector<8x128xi32>
    %150 = arith.sitofp %149 : vector<8x128xi32> to vector<8x128xf32>
    %151 = arith.truncf %150 : vector<8x128xf32> to vector<8x128xbf16>
    %cst_42 = arith.constant dense<0.000000e+00> : vector<8x384xf32>
    %152 = tpu.matmul %151, %1, %cst_42 {dimension_numbers = #tpu.dot_dimension_numbers<[1], [0], [0], [1], [0, 0, 1, 1], [], []>} : vector<8x128xbf16>, vector<128x384xbf16>, vector<8x384xf32> -> vector<8x384xf32>
    %153 = arith.truncf %152 : vector<8x384xf32> to vector<8x384xbf16>
    %c13 = arith.constant 13 : index
    %c0_43 = arith.constant 0 : index
    %c0_44 = arith.constant 0 : index
    %154 = vector.load %arg8[%c13, %c0_43, %c0_44] : memref<16x8x384xbf16, #tpu.memory_space<vmem>>, vector<1x8x384xbf16>
    %155 = vector.shape_cast %154 : vector<1x8x384xbf16> to vector<8x384xbf16>
    %156 = vector.shape_cast %153 : vector<8x384xbf16> to vector<1x8x384xbf16>
    tpu.vector_store %arg8[%c13, %c0_43, %c0_44], %156 {strides = array<i32>} : memref<16x8x384xbf16, #tpu.memory_space<vmem>>, vector<1x8x384xbf16>,
    %157 = vector.extract_strided_slice %0 {offsets = [0, 14], sizes = [8, 1], strides = [1, 1]} : vector<8x16xi32> to vector<8x1xi32>
    %158 = vector.broadcast %157 : vector<8x1xi32> to vector<8x128xi32>
    %159 = arith.cmpi eq, %158, %2 : vector<8x128xi32>
    %160 = arith.extui %159 : vector<8x128xi1> to vector<8x128xi32>
    %161 = arith.sitofp %160 : vector<8x128xi32> to vector<8x128xf32>
    %162 = arith.truncf %161 : vector<8x128xf32> to vector<8x128xbf16>
    %cst_45 = arith.constant dense<0.000000e+00> : vector<8x384xf32>
    %163 = tpu.matmul %162, %1, %cst_45 {dimension_numbers = #tpu.dot_dimension_numbers<[1], [0], [0], [1], [0, 0, 1, 1], [], []>} : vector<8x128xbf16>, vector<128x384xbf16>, vector<8x384xf32> -> vector<8x384xf32>
    %164 = arith.truncf %163 : vector<8x384xf32> to vector<8x384xbf16>
    %c14 = arith.constant 14 : index
    %c0_46 = arith.constant 0 : index
    %c0_47 = arith.constant 0 : index
    %165 = vector.load %arg8[%c14, %c0_46, %c0_47] : memref<16x8x384xbf16, #tpu.memory_space<vmem>>, vector<1x8x384xbf16>
    %166 = vector.shape_cast %165 : vector<1x8x384xbf16> to vector<8x384xbf16>
    %167 = vector.shape_cast %164 : vector<8x384xbf16> to vector<1x8x384xbf16>
    tpu.vector_store %arg8[%c14, %c0_46, %c0_47], %167 {strides = array<i32>} : memref<16x8x384xbf16, #tpu.memory_space<vmem>>, vector<1x8x384xbf16>,
    %168 = vector.extract_strided_slice %0 {offsets = [0, 15], sizes = [8, 1], strides = [1, 1]} : vector<8x16xi32> to vector<8x1xi32>
    %169 = vector.broadcast %168 : vector<8x1xi32> to vector<8x128xi32>
    %170 = arith.cmpi eq, %169, %2 : vector<8x128xi32>
    %171 = arith.extui %170 : vector<8x128xi1> to vector<8x128xi32>
    %172 = arith.sitofp %171 : vector<8x128xi32> to vector<8x128xf32>
    %173 = arith.truncf %172 : vector<8x128xf32> to vector<8x128xbf16>
    %cst_48 = arith.constant dense<0.000000e+00> : vector<8x384xf32>
    %174 = tpu.matmul %173, %1, %cst_48 {dimension_numbers = #tpu.dot_dimension_numbers<[1], [0], [0], [1], [0, 0, 1, 1], [], []>} : vector<8x128xbf16>, vector<128x384xbf16>, vector<8x384xf32> -> vector<8x384xf32>
    %175 = arith.truncf %174 : vector<8x384xf32> to vector<8x384xbf16>
    %c15 = arith.constant 15 : index
    %c0_49 = arith.constant 0 : index
    %c0_50 = arith.constant 0 : index
    %176 = vector.load %arg8[%c15, %c0_49, %c0_50] : memref<16x8x384xbf16, #tpu.memory_space<vmem>>, vector<1x8x384xbf16>
    %177 = vector.shape_cast %176 : vector<1x8x384xbf16> to vector<8x384xbf16>
    %178 = vector.shape_cast %175 : vector<8x384xbf16> to vector<1x8x384xbf16>
    tpu.vector_store %arg8[%c15, %c0_49, %c0_50], %178 {strides = array<i32>} : memref<16x8x384xbf16, #tpu.memory_space<vmem>>, vector<1x8x384xbf16>,
    %c0_51 = arith.constant 0 : index
    %c0_52 = arith.constant 0 : index
    %179 = vector.load %arg5[%c0_51, %c0_52] : memref<128x384xbf16, #tpu.memory_space<vmem>>, vector<128x384xbf16>
    %c0_53 = arith.constant 0 : index
    %c0_54 = arith.constant 0 : index
    %180 = vector.load %arg6[%c0_53, %c0_54] : memref<1x128xf32, #tpu.memory_space<vmem>>, vector<1x128xf32>
    %181 = vector.shape_cast %180 : vector<1x128xf32> to vector<1x128xf32>
    %182 = vector.broadcast %181 : vector<1x128xf32> to vector<8x128xf32>
    %c0_55 = arith.constant 0 : index
    %c0_56 = arith.constant 0 : index
    %183 = vector.load %arg3[%c0_55, %c0_56] : memref<8x1xi32, #tpu.memory_space<vmem>>, vector<8x1xi32>
    %184 = vector.shape_cast %183 : vector<8x1xi32> to vector<8x1xi32>
    %185 = vector.broadcast %184 : vector<8x1xi32> to vector<8x128xi32>
    %186 = arith.index_cast %arg0 : i32 to index
    %187 = memref.load %arg1[%186] : memref<1xi32, #tpu.memory_space<smem>>
    %cst_57 = arith.constant 0.000000e+00 : f32
    %188 = vector.broadcast %cst_57 : f32 to vector<8x128xf32>
    %c0_i32 = arith.constant 0 : i32
    %189 = arith.subi %187, %c0_i32 : i32
    %190 = arith.addi %c0_i32, %189 : i32
    %c1_i32 = arith.constant 1 : i32
    %191 = scf.for %arg9 = %c0_i32 to %190 step %c1_i32 iter_args(%arg10 = %188) -> (vector<8x128xf32>)  : i32 {
      %193 = arith.index_cast %arg9 : i32 to index
      %c0_60 = arith.constant 0 : index
      %c0_61 = arith.constant 0 : index
      %194 = vector.load %arg8[%193, %c0_60, %c0_61] : memref<16x8x384xbf16, #tpu.memory_space<vmem>>, vector<1x8x384xbf16>
      %195 = vector.shape_cast %194 : vector<1x8x384xbf16> to vector<8x384xbf16>
      %196 = arith.extf %195 : vector<8x384xbf16> to vector<8x384xf32>
      %197 = arith.truncf %arg10 : vector<8x128xf32> to vector<8x128xbf16>
      %cst_62 = arith.constant dense<0.000000e+00> : vector<8x384xf32>
      %198 = tpu.matmul %197, %179, %cst_62 {dimension_numbers = #tpu.dot_dimension_numbers<[1], [0], [0], [1], [0, 0, 1, 1], [], []>} : vector<8x128xbf16>, vector<128x384xbf16>, vector<8x384xf32> -> vector<8x384xf32>
      %199 = vector.extract_strided_slice %196 {offsets = [0, 0], sizes = [8, 128], strides = [1, 1]} : vector<8x384xf32> to vector<8x128xf32>
      %200 = vector.extract_strided_slice %198 {offsets = [0, 0], sizes = [8, 128], strides = [1, 1]} : vector<8x384xf32> to vector<8x128xf32>
      %201 = arith.addf %199, %200 : vector<8x128xf32>
      %202 = arith.negf %201 : vector<8x128xf32>
      %203 = math.exp %202 : vector<8x128xf32>
      %cst_63 = arith.constant 1.000000e+00 : f32
      %204 = vector.broadcast %cst_63 : f32 to vector<8x128xf32>
      %205 = arith.addf %204, %203 : vector<8x128xf32>
      %206 = arith.divf %204, %205 : vector<8x128xf32>
      %207 = vector.extract_strided_slice %196 {offsets = [0, 128], sizes = [8, 128], strides = [1, 1]} : vector<8x384xf32> to vector<8x128xf32>
      %208 = vector.extract_strided_slice %198 {offsets = [0, 128], sizes = [8, 128], strides = [1, 1]} : vector<8x384xf32> to vector<8x128xf32>
      %209 = arith.addf %207, %208 : vector<8x128xf32>
      %210 = arith.negf %209 : vector<8x128xf32>
      %211 = math.exp %210 : vector<8x128xf32>
      %cst_64 = arith.constant 1.000000e+00 : f32
      %212 = vector.broadcast %cst_64 : f32 to vector<8x128xf32>
      %213 = arith.addf %212, %211 : vector<8x128xf32>
      %214 = arith.divf %212, %213 : vector<8x128xf32>
      %215 = vector.extract_strided_slice %196 {offsets = [0, 256], sizes = [8, 128], strides = [1, 1]} : vector<8x384xf32> to vector<8x128xf32>
      %216 = vector.extract_strided_slice %198 {offsets = [0, 256], sizes = [8, 128], strides = [1, 1]} : vector<8x384xf32> to vector<8x128xf32>
      %217 = arith.addf %216, %182 : vector<8x128xf32>
      %218 = arith.mulf %206, %217 : vector<8x128xf32>
      %219 = arith.addf %215, %218 : vector<8x128xf32>
      %220 = math.tanh %219 : vector<8x128xf32>
      %221 = arith.subf %arg10, %220 : vector<8x128xf32>
      %222 = arith.mulf %214, %221 : vector<8x128xf32>
      %223 = arith.addf %220, %222 : vector<8x128xf32>
      %224 = vector.broadcast %arg9 : i32 to vector<8x128xi32>
      %225 = arith.cmpi slt, %224, %185 : vector<8x128xi32>
      %226 = arith.select %225, %223, %arg10 : vector<8x128xi1>, vector<8x128xf32>
      scf.yield %226 : vector<8x128xf32>
    }
    %c0_58 = arith.constant 0 : index
    %c0_59 = arith.constant 0 : index
    %192 = vector.load %arg7[%c0_58, %c0_59] : memref<8x128xf32, #tpu.memory_space<vmem>>, vector<8x128xf32>
    tpu.vector_store %arg7[%c0_58, %c0_59], %191 {strides = array<i32>} : memref<8x128xf32, #tpu.memory_space<vmem>>, vector<8x128xf32>,
    return
  }
  func.func @transform_0(%arg0: i32, %arg1: memref<1xi32, #tpu.memory_space<smem>>) -> (i32, i32) {
    %c0_i32 = arith.constant 0 : i32
    %c0_i32_0 = arith.constant 0 : i32
    return %arg0, %c0_i32 : i32, i32
  }
  func.func @transform_1(%arg0: i32, %arg1: memref<1xi32, #tpu.memory_space<smem>>) -> (i32, i32) {
    %c0_i32 = arith.constant 0 : i32
    %c0_i32_0 = arith.constant 0 : i32
    return %arg0, %c0_i32 : i32, i32
  }
  func.func @transform_2(%arg0: i32, %arg1: memref<1xi32, #tpu.memory_space<smem>>) -> (i32, i32) {
    %c0_i32 = arith.constant 0 : i32
    %c0_i32_0 = arith.constant 0 : i32
    %c0_i32_1 = arith.constant 0 : i32
    return %c0_i32, %c0_i32_0 : i32, i32
  }
  func.func @transform_3(%arg0: i32, %arg1: memref<1xi32, #tpu.memory_space<smem>>) -> (i32, i32) {
    %c0_i32 = arith.constant 0 : i32
    %c0_i32_0 = arith.constant 0 : i32
    %c0_i32_1 = arith.constant 0 : i32
    return %c0_i32, %c0_i32_0 : i32, i32
  }
  func.func @transform_4(%arg0: i32, %arg1: memref<1xi32, #tpu.memory_space<smem>>) -> (i32, i32) {
    %c0_i32 = arith.constant 0 : i32
    %c0_i32_0 = arith.constant 0 : i32
    %c0_i32_1 = arith.constant 0 : i32
    return %c0_i32, %c0_i32_0 : i32, i32
  }
  func.func @transform_5(%arg0: i32, %arg1: memref<1xi32, #tpu.memory_space<smem>>) -> (i32, i32) {
    %c0_i32 = arith.constant 0 : i32
    %c0_i32_0 = arith.constant 0 : i32
    return %arg0, %c0_i32 : i32, i32
  }
}

</mosaic_0001>

<bundles_post_ra>
// kernel: char_embedding_forward.1
= control target key start
LH: loop header
LB: loop body
LE: loop exit
PB: predicated region body
PF: predicated region fallthrough
CT: control target
= control target key end

     0   :  { %v3038_v1 = vmov 0   ;;  %v3039_v2 = vmov 2   ;;  %s4234_s0 = inlined_call_operand.<no memory space> [shape: s32[1], index: 0, kind: input, shape index: {}]   ;;  %s4235_s1 = inlined_call_operand.vmem [shape: s32[8,16], index: 1, kind: input, shape index: {}]   ;;  %s4236_s2 = inlined_call_operand.vmem [shape: s32[8,1], index: 2, kind: input, shape index: {}]   ;;  %s4237_s3 = inlined_call_operand.vmem [shape: bf16[128,384], index: 3, kind: input, shape index: {}]   ;;  %s4238_s4 = inlined_call_operand.vmem [shape: bf16[128,384], index: 4, kind: input, shape index: {}]   ;;  %s4239_s5 = inlined_call_operand.vmem [shape: f32[1,128], index: 5, kind: input, shape index: {}]   ;;  %s4240_s6 = inlined_call_operand.hbm [shape: f32[8,128], index: 6, kind: output, shape index: {}]  }
   0x1   :  { %v3099_v0 = vld [vmem:[%s4235_s1] sm:$0xff]  ;;  %2906 = vset.pattern.permute.xlu0 %v3038_v1  ;;  %2908 = vset.pattern.permute.xlu1 %v3039_v2 }
   0x2   :  { %12 = vsyncpa [#allocation6], 0  ;;  %v3105_v3 = vld [vmem:[%s4237_s3 + $0x4] ss:$12 sps:$4 sm:$0xff]   ;;  %60 = vperm.xlu0 %2906, %v3099_v0   ;;  %395 = vperm.xlu1 %2908, %v3099_v0   ;;  %v3112_v4 = vld [vmem:[%s4237_s3] ss:$12 sps:$4 sm:$0xff]   ;;  %v57_v34 = vlaneseq }
   0x3   :  { %194 = vmatprep.subr.bf16.mxu0 %v3105_v3  ;;  %v3040_v5 = vmov 0.0   ;;  %v3119_v6 = vld [vmem:[%s4237_s3 + $0x8] ss:$12 sps:$4 sm:$0xff]   ;;  %v3130_v8 = vld [vmem:[%s4237_s3 + $0x18] ss:$12 sps:$4 sm:$0xff]   ;;  %226 = vmatprep.mubr.bf16.mxu0 %v3038_v1  ;;  %v3041_v10 = vmov 1  }
   0x4   :  { %2519 = vmatprep.subr.bf16.mxu1 %v3040_v5  ;;  %195 = vmatpush1.bf16.msra.mxu0 %v3112_v4  ;;  %v3125_v7 = vld [vmem:[%s4237_s3 + $0x1c] ss:$12 sps:$4 sm:$0xff]   ;;  %v3137_v9 = vld [vmem:[%s4237_s3 + $0x20] ss:$12 sps:$4 sm:$0xff]   ;;  %v3042_v11 = vmov 3   ;;  %v3043_v16 = vmov 4  }
   0x5   :  { %2520 = vmatpush3.bf16.msra.mxu1 %v3119_v6  ;;  %v3142_v12 = vld [vmem:[%s4237_s3 + $0x34] ss:$12 sps:$4 sm:$0xff]   ;;  %196 = vmatprep.subr.bf16.mxu0 %v3125_v7  ;;  %v3151_v13 = vld [vmem:[%s4237_s3 + $0x30] ss:$12 sps:$4 sm:$0xff]   ;;  %v3158_v14 = vld [vmem:[%s4237_s3 + $0x38] ss:$12 sps:$4 sm:$0xff]  }
   0x6   :  { %2907 = vset.pattern.permute.xlu0 %v3041_v10  ;;  %2909 = vset.pattern.permute.xlu1 %v3042_v11  ;;  %v3165_v15 = vld [vmem:[%s4237_s3 + $0x4c] ss:$12 sps:$4 sm:$0xff]   ;;  %vm3044_vm0 = vmmov 0   ;;  %v3175_v17 = vld [vmem:[%s4237_s3 + $0x48] ss:$12 sps:$4 sm:$0xff]   ;;  %v3045_v31 = vmov 5  }
   0x7   :  { %291 = vperm.xlu0 %2907, %v3099_v0   ;;  %499 = vperm.xlu1 %2909, %v3099_v0   ;;  %v3180_v18 = vld [vmem:[%s4237_s3 + $0x50] ss:$12 sps:$4 sm:$0xff]   ;;  %v3192_v20 = vld [vmem:[%s4237_s3 + $0x60] ss:$12 sps:$4 sm:$0xff]   ;;  %v3199_v21 = vld [vmem:[%s4237_s3 + $0x68] ss:$12 sps:$4 sm:$0xff]  }
   0x8   :  { %2521 = vmatprep.subr.bf16.mxu1 %v3040_v5  ;;  %197 = vmatpush1.bf16.msra.mxu0 %v3130_v8  ;;  %v3187_v19 = vld [vmem:[%s4237_s3 + $0x64] ss:$12 sps:$4 sm:$0xff]   ;;  %v3206_v22 = vld [vmem:[%s4237_s3 + $0x7c] ss:$12 sps:$4 sm:$0xff]   ;;  %v3218_v24 = vld [vmem:[%s4237_s3 + $0x80] ss:$12 sps:$4 sm:$0xff]  }
   0x9   :  { %2522 = vmatpush3.bf16.msra.mxu1 %v3137_v9  ;;  %198 = vmatprep.subr.bf16.mxu0 %v3142_v12  ;;  %v3213_v23 = vld [vmem:[%s4237_s3 + $0x78] ss:$12 sps:$4 sm:$0xff]   ;;  %v3225_v25 = vld [vmem:[%s4237_s3 + $0x94] ss:$12 sps:$4 sm:$0xff]   ;;  %v3232_v26 = vld [vmem:[%s4237_s3 + $0x90] ss:$12 sps:$4 sm:$0xff]  }
   0xa   :  { %2523 = vmatprep.subr.bf16.mxu1 %v3040_v5  ;;  %2535 = vmatprep.mubr.msk.bf16.mxu1 %vm3044_vm0, %v3040_v5  ;;  %v3237_v27 = vld [vmem:[%s4237_s3 + $0x98] ss:$12 sps:$4 sm:$0xff]   ;;  %v3251_v29 = vld [vmem:[%s4237_s3 + $0xa8] ss:$12 sps:$4 sm:$0xff]   ;;  %v3256_v30 = vld [vmem:[%s4237_s3 + $0xb0] ss:$12 sps:$4 sm:$0xff]  }
   0xb   :  { %2910 = vset.pattern.permute.xlu1 %v3043_v16  ;;  %v3244_v28 = vld [vmem:[%s4237_s3 + $0xac] ss:$12 sps:$4 sm:$0xff]   ;;  %2911 = vset.pattern.permute.xlu0 %v3045_v31  ;;  %v3046_v32 = vmov 6   ;;  %v3047_v33 = vmov 7   ;;  %v3267_v35 = vand.u32 127, %v57_v34  ;;  %v3048_v36 = vmov 8  }
   0xc   :  { %603 = vperm.xlu1 %2910, %v3099_v0   ;;  %199 = vmatpush1.bf16.msra.mxu0 %v3151_v13  ;;  %v3049_v38 = vmov 1.0|1.0   ;;  %v3050_v40 = vmov 9   ;;  %v3051_v42 = vmov 10   ;;  %v3052_v44 = vmov 11   ;;  %p2305_p0 = scmp.le.s32.totalorder %s4234_s0, 0 }
   0xd   :  { %2524 = vmatpush3.bf16.msra.mxu1 %v3158_v14  ;;  %200 = vmatprep.subr.bf16.mxu0 %v3165_v15  ;;  %v3053_v46 = vmov 12   ;;  %v3054_v48 = vmov 13   ;;  %v3055_v50 = vmov 14   ;;  %v3056_v62 = vmov 15   ;;  %s4147_s30 = smov (!%p2305_p0), 0  }
   0xe   :  { %2525 = vmatprep.subr.bf16.mxu1 %v3040_v5  ;;  %707 = vperm.xlu0 %2911, %v3099_v0  }
  0x10   :  { %201 = vmatpush1.bf16.msra.mxu0 %v3175_v17  ;;  %2912 = vset.pattern.permute.xlu1 %v3046_v32 }
  0x11   :  { %2526 = vmatpush3.bf16.msra.mxu1 %v3180_v18  ;;  %202 = vmatprep.subr.bf16.mxu0 %v3187_v19 }
  0x12   :  { %2527 = vmatprep.subr.bf16.mxu1 %v3040_v5  ;;  %811 = vperm.xlu1 %2912, %v3099_v0  }
  0x13   :  { %2914 = vset.pattern.permute.xlu0 %v3048_v36 }
  0x14   :  { %203 = vmatpush1.bf16.msra.mxu0 %v3192_v20  ;;  %1019 = vperm.xlu0 %2914, %v3099_v0  }
  0x15   :  { %2528 = vmatpush3.bf16.msra.mxu1 %v3199_v21  ;;  %204 = vmatprep.subr.bf16.mxu0 %v3206_v22 }
  0x16   :  { %2529 = vmatprep.subr.bf16.mxu1 %v3040_v5  ;;  %2913 = vset.pattern.permute.xlu1 %v3047_v33 }
  0x17   :  { %915 = vperm.xlu1 %2913, %v3099_v0  }
  0x18   :  { %205 = vmatpush1.bf16.msra.mxu0 %v3213_v23  ;;  %2917 = vset.pattern.permute.xlu0 %v3052_v44  ;;  %v3638_v44 = vld [vmem:[%s4237_s3 + $0x8] ss:$12 sps:$4 sm:$0xff]  }
  0x19   :  { %2530 = vmatpush3.bf16.msra.mxu1 %v3218_v24  ;;  %206 = vmatprep.subr.bf16.mxu0 %v3225_v25 }
  0x1a   :  { %2531 = vmatprep.subr.bf16.mxu1 %v3040_v5  ;;  %1331 = vperm.xlu0 %2917, %v3099_v0  }
  0x1b   :  { %2915 = vset.pattern.permute.xlu1 %v3050_v40 }
  0x1c   :  { %207 = vmatpush1.bf16.msra.mxu0 %v3232_v26  ;;  %1123 = vperm.xlu1 %2915, %v3099_v0  }
  0x1d   :  { %2532 = vmatpush3.bf16.msra.mxu1 %v3237_v27  ;;  %208 = vmatprep.subr.bf16.mxu0 %v3244_v28 }
  0x1e   :  { %2533 = vmatprep.subr.bf16.mxu1 %v3040_v5  ;;  %2920 = vset.pattern.permute.xlu0 %v3055_v50 }
  0x1f   :  { %1643 = vperm.xlu0 %2920, %v3099_v0  }
  0x20   :  { %209 = vmatpush1.bf16.msra.mxu0 %v3251_v29  ;;  %2916 = vset.pattern.permute.xlu1 %v3051_v42  ;;  %v3623_v42 = vld [vmem:[%s4237_s3 + $0x4] ss:$12 sps:$4 sm:$0xff]  }
  0x21   :  { %2534 = vmatpush3.bf16.msra.mxu1 %v3256_v30  ;;  %297 = vmatprep.subr.bf16.mxu0 %v3105_v3 }
  0x22   :  { %2539 = vmatprep.subr.bf16.mxu1 %v3040_v5  ;;  %1227 = vperm.xlu1 %2916, %v3099_v0  }
  0x23   :  { %2923 = vset.pattern.permute.xlu0 %v3038_v1 }
  0x26   :  { %2918 = vset.pattern.permute.xlu1 %v3053_v46  ;;  %v3654_v46 = vld [vmem:[%s4237_s3 + $0x18] ss:$12 sps:$4 sm:$0xff]  }
  0x27   :  { %1435 = vperm.xlu1 %2918, %v3099_v0  }
  0x2b   :  { %2919 = vset.pattern.permute.xlu1 %v3054_v48  ;;  %v3666_v48 = vld [vmem:[%s4237_s3 + $0x34] ss:$12 sps:$4 sm:$0xff]  }
  0x2c   :  { %1539 = vperm.xlu1 %2919, %v3099_v0  }
  0x30   :  { %2921 = vset.pattern.permute.xlu1 %v3056_v62 }
  0x31   :  { %1747 = vperm.xlu1 %2921, %v3099_v0  }
  0x35   :  { %2922 = vset.pattern.permute.xlu1 %v3038_v1 }
  0x81   :  { %v61_v37 = vpop.permute.xlu0 %60  ;;  %v396_v41 = vpop.permute.xlu1 %395 }
  0x82   :  { %vm62_vm1 = vcmp.eq.s32.totalorder %v61_v37, %v3267_v35  ;;  %vm397_vm5 = vcmp.eq.s32.totalorder %v396_v41, %v3267_v35 }
  0x83   :  { %vm2193_vm2 = vmpackc.low %vm62_vm1, %vm62_vm1 }
  0x84   :  { %2194 = vmatmul.mubr.msk.bf16.vlgmr.msra.gmra.mrb[0].mxu0 %vm2193_vm2, %v3049_v38  ;;  %2536 = vmatmul.mubr.msk.bf16.vlgmr.msra.gmra.mrb[0].mxu1 %vm2193_vm2, %v3049_v38  ;;  %vm2207_vm6 = vmpackc.low %vm397_vm5, %vm397_vm5 }
  0x85   :  { %298 = vmatpush1.bf16.msra.mxu0 %v3112_v4  ;;  %2540 = vmatpush3.bf16.msra.mxu1 %v3119_v6 }
  0x86   :  { %299 = vmatprep.subr.bf16.mxu0 %v3125_v7  ;;  %2541 = vmatprep.subr.bf16.mxu1 %v3040_v5  ;;  %v292_v39 = vpop.permute.xlu0 %291  ;;  %v500_v43 = vpop.permute.xlu1 %499 }
  0x87   :  { %329 = vmatprep.mubr.bf16.mxu0 %v3038_v1  ;;  %2555 = vmatprep.mubr.msk.bf16.mxu1 %vm3044_vm0, %v3040_v5  ;;  %vm293_vm3 = vcmp.eq.s32.totalorder %v292_v39, %v3267_v35  ;;  %vm501_vm7 = vcmp.eq.s32.totalorder %v500_v43, %v3267_v35  ;;  %v3632_v43 = vld [vmem:[%s4237_s3] ss:$12 sps:$4 sm:$0xff]  }
  0x88   :  { %vm2200_vm4 = vmpackc.low %vm293_vm3, %vm293_vm3 }
  0x89   :  { %300 = vmatpush1.bf16.msra.mxu0 %v3130_v8  ;;  %2542 = vmatpush3.bf16.msra.mxu1 %v3137_v9  ;;  %vm2214_vm8 = vmpackc.low %vm501_vm7, %vm501_vm7 }
  0x8a   :  { %301 = vmatprep.subr.bf16.mxu0 %v3142_v12  ;;  %2543 = vmatprep.subr.bf16.mxu1 %v3040_v5 }
  0x8b   :  { %v604_v45 = vpop.permute.xlu1 %603 }
  0x8c   :  { %vm605_vm9 = vcmp.eq.s32.totalorder %v604_v45, %v3267_v35  ;;  %v3644_v45 = vld [vmem:[%s4237_s3 + $0x1c] ss:$12 sps:$4 sm:$0xff]  }
  0x8d   :  { %302 = vmatpush1.bf16.msra.mxu0 %v3151_v13  ;;  %2544 = vmatpush3.bf16.msra.mxu1 %v3158_v14  ;;  %vm2221_vm10 = vmpackc.low %vm605_vm9, %vm605_vm9  ;;  %v708_v47 = vpop.permute.xlu0 %707 }
  0x8e   :  { %303 = vmatprep.subr.bf16.mxu0 %v3165_v15  ;;  %2545 = vmatprep.subr.bf16.mxu1 %v3040_v5  ;;  %vm709_vm11 = vcmp.eq.s32.totalorder %v708_v47, %v3267_v35  ;;  %v3660_v47 = vld [vmem:[%s4237_s3 + $0x20] ss:$12 sps:$4 sm:$0xff]  }
  0x8f   :  { %vm2228_vm12 = vmpackc.low %vm709_vm11, %vm709_vm11 }
  0x91   :  { %304 = vmatpush1.bf16.msra.mxu0 %v3175_v17  ;;  %2546 = vmatpush3.bf16.msra.mxu1 %v3180_v18  ;;  %v812_v49 = vpop.permute.xlu1 %811 }
  0x92   :  { %305 = vmatprep.subr.bf16.mxu0 %v3187_v19  ;;  %2547 = vmatprep.subr.bf16.mxu1 %v3040_v5  ;;  %vm813_vm13 = vcmp.eq.s32.totalorder %v812_v49, %v3267_v35 }
  0x93   :  { %vm2235_vm14 = vmpackc.low %vm813_vm13, %vm813_vm13  ;;  %v1020_v36 = vpop.permute.xlu0 %1019 }
  0x94   :  { %vm1021_vm2 = vcmp.eq.s32.totalorder %v1020_v36, %v3267_v35 }
  0x95   :  { %306 = vmatpush1.bf16.msra.mxu0 %v3192_v20  ;;  %2548 = vmatpush3.bf16.msra.mxu1 %v3199_v21  ;;  %vm2249_vm3 = vmpackc.low %vm1021_vm2, %vm1021_vm2 }
  0x96   :  { %307 = vmatprep.subr.bf16.mxu0 %v3206_v22  ;;  %2549 = vmatprep.subr.bf16.mxu1 %v3040_v5  ;;  %v916_v61 = vpop.permute.xlu1 %915 }
  0x97   :  { %vm917_vm15 = vcmp.eq.s32.totalorder %v916_v61, %v3267_v35  ;;  %v3774_v61 = vld [vmem:[%s4237_s3 + $0x80] ss:$12 sps:$4 sm:$0xff]  }
  0x98   :  { %vm2242_vm1 = vmpackc.low %vm917_vm15, %vm917_vm15 }
  0x99   :  { %308 = vmatpush1.bf16.msra.mxu0 %v3213_v23  ;;  %2550 = vmatpush3.bf16.msra.mxu1 %v3218_v24 }
  0x9a   :  { %309 = vmatprep.subr.bf16.mxu0 %v3225_v25  ;;  %2551 = vmatprep.subr.bf16.mxu1 %v3040_v5 }
  0x9b   :  { %v1124_v41 = vpop.permute.xlu1 %1123 }
  0x9d   :  { %310 = vmatpush1.bf16.msra.mxu0 %v3232_v26  ;;  %2552 = vmatpush3.bf16.msra.mxu1 %v3237_v27 }
  0x9e   :  { %311 = vmatprep.subr.bf16.mxu0 %v3244_v28  ;;  %2553 = vmatprep.subr.bf16.mxu1 %v3040_v5 }
  0xa1   :  { %312 = vmatpush1.bf16.msra.mxu0 %v3251_v29  ;;  %2554 = vmatpush3.bf16.msra.mxu1 %v3256_v30 }
  0xa2   :  { %401 = vmatprep.subr.bf16.mxu0 %v3105_v3  ;;  %2559 = vmatprep.subr.bf16.mxu1 %v3040_v5 }
  0xa4   :  { %2201 = vmatmul.mubr.msk.bf16.vlgmr.msra.gmra.mrb[4].mxu0 %vm2200_vm4, %v3049_v38  ;;  %2556 = vmatmul.mubr.msk.bf16.vlgmr.msra.gmra.mrb[4].mxu1 %vm2200_vm4, %v3049_v38  ;;  %vm1125_vm4 = vcmp.eq.s32.totalorder %v1124_v41, %v3267_v35 }
  0xa5   :  { %402 = vmatpush1.bf16.msra.mxu0 %v3112_v4  ;;  %2560 = vmatpush3.bf16.msra.mxu1 %v3119_v6  ;;  %vm2256_vm5 = vmpackc.low %vm1125_vm4, %vm1125_vm4 }
  0xa6   :  { %403 = vmatprep.subr.bf16.mxu0 %v3125_v7  ;;  %2561 = vmatprep.subr.bf16.mxu1 %v3040_v5 }
  0xa7   :  { %433 = vmatprep.mubr.bf16.mxu0 %v3038_v1  ;;  %2575 = vmatprep.mubr.msk.bf16.mxu1 %vm3044_vm0, %v3040_v5 }
  0xa9   :  { %404 = vmatpush1.bf16.msra.mxu0 %v3130_v8  ;;  %2562 = vmatpush3.bf16.msra.mxu1 %v3137_v9 }
  0xaa   :  { %405 = vmatprep.subr.bf16.mxu0 %v3142_v12  ;;  %2563 = vmatprep.subr.bf16.mxu1 %v3040_v5 }
  0xad   :  { %406 = vmatpush1.bf16.msra.mxu0 %v3151_v13  ;;  %2564 = vmatpush3.bf16.msra.mxu1 %v3158_v14 }
  0xae   :  { %407 = vmatprep.subr.bf16.mxu0 %v3165_v15  ;;  %2565 = vmatprep.subr.bf16.mxu1 %v3040_v5 }
  0xb1   :  { %408 = vmatpush1.bf16.msra.mxu0 %v3175_v17  ;;  %2566 = vmatpush3.bf16.msra.mxu1 %v3180_v18 }
  0xb2   :  { %409 = vmatprep.subr.bf16.mxu0 %v3187_v19  ;;  %2567 = vmatprep.subr.bf16.mxu1 %v3040_v5 }
  0xb5   :  { %410 = vmatpush1.bf16.msra.mxu0 %v3192_v20  ;;  %2568 = vmatpush3.bf16.msra.mxu1 %v3199_v21 }
  0xb6   :  { %411 = vmatprep.subr.bf16.mxu0 %v3206_v22  ;;  %2569 = vmatprep.subr.bf16.mxu1 %v3040_v5 }
  0xb9   :  { %412 = vmatpush1.bf16.msra.mxu0 %v3213_v23  ;;  %2570 = vmatpush3.bf16.msra.mxu1 %v3218_v24 }
  0xba   :  { %413 = vmatprep.subr.bf16.mxu0 %v3225_v25  ;;  %2571 = vmatprep.subr.bf16.mxu1 %v3040_v5 }
  0xbd   :  { %414 = vmatpush1.bf16.msra.mxu0 %v3232_v26  ;;  %2572 = vmatpush3.bf16.msra.mxu1 %v3237_v27 }
  0xbe   :  { %415 = vmatprep.subr.bf16.mxu0 %v3244_v28  ;;  %2573 = vmatprep.subr.bf16.mxu1 %v3040_v5 }
  0xc1   :  { %416 = vmatpush1.bf16.msra.mxu0 %v3251_v29  ;;  %2574 = vmatpush3.bf16.msra.mxu1 %v3256_v30 }
  0xc2   :  { %505 = vmatprep.subr.bf16.mxu0 %v3105_v3  ;;  %2579 = vmatprep.subr.bf16.mxu1 %v3040_v5 }
  0xc4   :  { %2208 = vmatmul.mubr.msk.bf16.vlgmr.msra.gmra.mrb[8].mxu0 %vm2207_vm6, %v3049_v38  ;;  %2576 = vmatmul.mubr.msk.bf16.vlgmr.msra.gmra.mrb[8].mxu1 %vm2207_vm6, %v3049_v38 }
  0xc5   :  { %506 = vmatpush1.bf16.msra.mxu0 %v3112_v4  ;;  %2580 = vmatpush3.bf16.msra.mxu1 %v3119_v6 }
  0xc6   :  { %507 = vmatprep.subr.bf16.mxu0 %v3125_v7  ;;  %2581 = vmatprep.subr.bf16.mxu1 %v3040_v5 }
  0xc7   :  { %537 = vmatprep.mubr.bf16.mxu0 %v3038_v1  ;;  %2595 = vmatprep.mubr.msk.bf16.mxu1 %vm3044_vm0, %v3040_v5 }
  0xc9   :  { %508 = vmatpush1.bf16.msra.mxu0 %v3130_v8  ;;  %2582 = vmatpush3.bf16.msra.mxu1 %v3137_v9 }
  0xca   :  { %509 = vmatprep.subr.bf16.mxu0 %v3142_v12  ;;  %2583 = vmatprep.subr.bf16.mxu1 %v3040_v5 }
  0xcd   :  { %510 = vmatpush1.bf16.msra.mxu0 %v3151_v13  ;;  %2584 = vmatpush3.bf16.msra.mxu1 %v3158_v14 }
  0xce   :  { %511 = vmatprep.subr.bf16.mxu0 %v3165_v15  ;;  %2585 = vmatprep.subr.bf16.mxu1 %v3040_v5 }
  0xd1   :  { %512 = vmatpush1.bf16.msra.mxu0 %v3175_v17  ;;  %2586 = vmatpush3.bf16.msra.mxu1 %v3180_v18 }
  0xd2   :  { %513 = vmatprep.subr.bf16.mxu0 %v3187_v19  ;;  %2587 = vmatprep.subr.bf16.mxu1 %v3040_v5 }
  0xd5   :  { %514 = vmatpush1.bf16.msra.mxu0 %v3192_v20  ;;  %2588 = vmatpush3.bf16.msra.mxu1 %v3199_v21 }
  0xd6   :  { %515 = vmatprep.subr.bf16.mxu0 %v3206_v22  ;;  %2589 = vmatprep.subr.bf16.mxu1 %v3040_v5 }
  0xd9   :  { %516 = vmatpush1.bf16.msra.mxu0 %v3213_v23  ;;  %2590 = vmatpush3.bf16.msra.mxu1 %v3218_v24 }
  0xda   :  { %517 = vmatprep.subr.bf16.mxu0 %v3225_v25  ;;  %2591 = vmatprep.subr.bf16.mxu1 %v3040_v5 }
  0xdd   :  { %518 = vmatpush1.bf16.msra.mxu0 %v3232_v26  ;;  %2592 = vmatpush3.bf16.msra.mxu1 %v3237_v27 }
  0xde   :  { %519 = vmatprep.subr.bf16.mxu0 %v3244_v28  ;;  %2593 = vmatprep.subr.bf16.mxu1 %v3040_v5 }
  0xe1   :  { %520 = vmatpush1.bf16.msra.mxu0 %v3251_v29  ;;  %2594 = vmatpush3.bf16.msra.mxu1 %v3256_v30 }
  0xe2   :  { %609 = vmatprep.subr.bf16.mxu0 %v3105_v3  ;;  %2599 = vmatprep.subr.bf16.mxu1 %v3040_v5 }
  0xe4   :  { %2215 = vmatmul.mubr.msk.bf16.vlgmr.msra.gmra.mrb[12].mxu0 %vm2214_vm8, %v3049_v38  ;;  %2596 = vmatmul.mubr.msk.bf16.vlgmr.msra.gmra.mrb[12].mxu1 %vm2214_vm8, %v3049_v38 }
  0xe5   :  { %610 = vmatpush1.bf16.msra.mxu0 %v3112_v4  ;;  %2600 = vmatpush3.bf16.msra.mxu1 %v3119_v6 }
  0xe6   :  { %611 = vmatprep.subr.bf16.mxu0 %v3125_v7  ;;  %2601 = vmatprep.subr.bf16.mxu1 %v3040_v5 }
  0xe7   :  { %641 = vmatprep.mubr.bf16.mxu0 %v3038_v1  ;;  %2615 = vmatprep.mubr.msk.bf16.mxu1 %vm3044_vm0, %v3040_v5 }
  0xe9   :  { %612 = vmatpush1.bf16.msra.mxu0 %v3130_v8  ;;  %2602 = vmatpush3.bf16.msra.mxu1 %v3137_v9 }
  0xea   :  { %613 = vmatprep.subr.bf16.mxu0 %v3142_v12  ;;  %2603 = vmatprep.subr.bf16.mxu1 %v3040_v5 }
  0xed   :  { %614 = vmatpush1.bf16.msra.mxu0 %v3151_v13  ;;  %2604 = vmatpush3.bf16.msra.mxu1 %v3158_v14 }
  0xee   :  { %615 = vmatprep.subr.bf16.mxu0 %v3165_v15  ;;  %2605 = vmatprep.subr.bf16.mxu1 %v3040_v5 }
  0xf1   :  { %616 = vmatpush1.bf16.msra.mxu0 %v3175_v17  ;;  %2606 = vmatpush3.bf16.msra.mxu1 %v3180_v18 }
  0xf2   :  { %617 = vmatprep.subr.bf16.mxu0 %v3187_v19  ;;  %2607 = vmatprep.subr.bf16.mxu1 %v3040_v5 }
  0xf5   :  { %618 = vmatpush1.bf16.msra.mxu0 %v3192_v20  ;;  %2608 = vmatpush3.bf16.msra.mxu1 %v3199_v21 }
  0xf6   :  { %619 = vmatprep.subr.bf16.mxu0 %v3206_v22  ;;  %2609 = vmatprep.subr.bf16.mxu1 %v3040_v5 }
  0xf9   :  { %620 = vmatpush1.bf16.msra.mxu0 %v3213_v23  ;;  %2610 = vmatpush3.bf16.msra.mxu1 %v3218_v24 }
  0xfa   :  { %621 = vmatprep.subr.bf16.mxu0 %v3225_v25  ;;  %2611 = vmatprep.subr.bf16.mxu1 %v3040_v5 }
  0xfd   :  { %622 = vmatpush1.bf16.msra.mxu0 %v3232_v26  ;;  %2612 = vmatpush3.bf16.msra.mxu1 %v3237_v27 }
  0xfe   :  { %623 = vmatprep.subr.bf16.mxu0 %v3244_v28  ;;  %2613 = vmatprep.subr.bf16.mxu1 %v3040_v5 }
 0x101   :  { %624 = vmatpush1.bf16.msra.mxu0 %v3251_v29  ;;  %2614 = vmatpush3.bf16.msra.mxu1 %v3256_v30 }
 0x102   :  { %713 = vmatprep.subr.bf16.mxu0 %v3105_v3  ;;  %2619 = vmatprep.subr.bf16.mxu1 %v3040_v5 }
 0x104   :  { %2222 = vmatmul.mubr.msk.bf16.vlgmr.msra.gmra.mrb[16].mxu0 %vm2221_vm10, %v3049_v38  ;;  %2616 = vmatmul.mubr.msk.bf16.vlgmr.msra.gmra.mrb[16].mxu1 %vm2221_vm10, %v3049_v38 }
 0x105   :  { %714 = vmatpush1.bf16.msra.mxu0 %v3112_v4  ;;  %2620 = vmatpush3.bf16.msra.mxu1 %v3119_v6 }
 0x106   :  { %715 = vmatprep.subr.bf16.mxu0 %v3125_v7  ;;  %2621 = vmatprep.subr.bf16.mxu1 %v3040_v5 }
 0x107   :  { %745 = vmatprep.mubr.bf16.mxu0 %v3038_v1  ;;  %2635 = vmatprep.mubr.msk.bf16.mxu1 %vm3044_vm0, %v3040_v5 }
 0x109   :  { %716 = vmatpush1.bf16.msra.mxu0 %v3130_v8  ;;  %2622 = vmatpush3.bf16.msra.mxu1 %v3137_v9 }
 0x10a   :  { %717 = vmatprep.subr.bf16.mxu0 %v3142_v12  ;;  %2623 = vmatprep.subr.bf16.mxu1 %v3040_v5 }
 0x10d   :  { %718 = vmatpush1.bf16.msra.mxu0 %v3151_v13  ;;  %2624 = vmatpush3.bf16.msra.mxu1 %v3158_v14 }
 0x10e   :  { %719 = vmatprep.subr.bf16.mxu0 %v3165_v15  ;;  %2625 = vmatprep.subr.bf16.mxu1 %v3040_v5 }
 0x111   :  { %720 = vmatpush1.bf16.msra.mxu0 %v3175_v17  ;;  %2626 = vmatpush3.bf16.msra.mxu1 %v3180_v18 }
 0x112   :  { %721 = vmatprep.subr.bf16.mxu0 %v3187_v19  ;;  %2627 = vmatprep.subr.bf16.mxu1 %v3040_v5 }
 0x115   :  { %722 = vmatpush1.bf16.msra.mxu0 %v3192_v20  ;;  %2628 = vmatpush3.bf16.msra.mxu1 %v3199_v21 }
 0x116   :  { %723 = vmatprep.subr.bf16.mxu0 %v3206_v22  ;;  %2629 = vmatprep.subr.bf16.mxu1 %v3040_v5 }
 0x119   :  { %724 = vmatpush1.bf16.msra.mxu0 %v3213_v23  ;;  %2630 = vmatpush3.bf16.msra.mxu1 %v3218_v24 }
 0x11a   :  { %725 = vmatprep.subr.bf16.mxu0 %v3225_v25  ;;  %2631 = vmatprep.subr.bf16.mxu1 %v3040_v5 }
 0x11d   :  { %726 = vmatpush1.bf16.msra.mxu0 %v3232_v26  ;;  %2632 = vmatpush3.bf16.msra.mxu1 %v3237_v27 }
 0x11e   :  { %727 = vmatprep.subr.bf16.mxu0 %v3244_v28  ;;  %2633 = vmatprep.subr.bf16.mxu1 %v3040_v5 }
 0x121   :  { %728 = vmatpush1.bf16.msra.mxu0 %v3251_v29  ;;  %2634 = vmatpush3.bf16.msra.mxu1 %v3256_v30 }
 0x122   :  { %817 = vmatprep.subr.bf16.mxu0 %v3105_v3  ;;  %2639 = vmatprep.subr.bf16.mxu1 %v3040_v5 }
 0x124   :  { %2229 = vmatmul.mubr.msk.bf16.vlgmr.msra.gmra.mrb[20].mxu0 %vm2228_vm12, %v3049_v38  ;;  %2636 = vmatmul.mubr.msk.bf16.vlgmr.msra.gmra.mrb[20].mxu1 %vm2228_vm12, %v3049_v38 }
 0x125   :  { %818 = vmatpush1.bf16.msra.mxu0 %v3112_v4  ;;  %2640 = vmatpush3.bf16.msra.mxu1 %v3119_v6 }
 0x126   :  { %819 = vmatprep.subr.bf16.mxu0 %v3125_v7  ;;  %2641 = vmatprep.subr.bf16.mxu1 %v3040_v5 }
 0x127   :  { %849 = vmatprep.mubr.bf16.mxu0 %v3038_v1  ;;  %2655 = vmatprep.mubr.msk.bf16.mxu1 %vm3044_vm0, %v3040_v5 }
 0x129   :  { %820 = vmatpush1.bf16.msra.mxu0 %v3130_v8  ;;  %2642 = vmatpush3.bf16.msra.mxu1 %v3137_v9 }
 0x12a   :  { %821 = vmatprep.subr.bf16.mxu0 %v3142_v12  ;;  %2643 = vmatprep.subr.bf16.mxu1 %v3040_v5 }
 0x12d   :  { %822 = vmatpush1.bf16.msra.mxu0 %v3151_v13  ;;  %2644 = vmatpush3.bf16.msra.mxu1 %v3158_v14 }
 0x12e   :  { %823 = vmatprep.subr.bf16.mxu0 %v3165_v15  ;;  %2645 = vmatprep.subr.bf16.mxu1 %v3040_v5 }
 0x131   :  { %824 = vmatpush1.bf16.msra.mxu0 %v3175_v17  ;;  %2646 = vmatpush3.bf16.msra.mxu1 %v3180_v18 }
 0x132   :  { %825 = vmatprep.subr.bf16.mxu0 %v3187_v19  ;;  %2647 = vmatprep.subr.bf16.mxu1 %v3040_v5 }
 0x135   :  { %826 = vmatpush1.bf16.msra.mxu0 %v3192_v20  ;;  %2648 = vmatpush3.bf16.msra.mxu1 %v3199_v21 }
 0x136   :  { %827 = vmatprep.subr.bf16.mxu0 %v3206_v22  ;;  %2649 = vmatprep.subr.bf16.mxu1 %v3040_v5 }
 0x139   :  { %828 = vmatpush1.bf16.msra.mxu0 %v3213_v23  ;;  %2650 = vmatpush3.bf16.msra.mxu1 %v3218_v24 }
 0x13a   :  { %829 = vmatprep.subr.bf16.mxu0 %v3225_v25  ;;  %2651 = vmatprep.subr.bf16.mxu1 %v3040_v5 }
 0x13d   :  { %830 = vmatpush1.bf16.msra.mxu0 %v3232_v26  ;;  %2652 = vmatpush3.bf16.msra.mxu1 %v3237_v27 }
 0x13e   :  { %831 = vmatprep.subr.bf16.mxu0 %v3244_v28  ;;  %2653 = vmatprep.subr.bf16.mxu1 %v3040_v5 }
 0x141   :  { %832 = vmatpush1.bf16.msra.mxu0 %v3251_v29  ;;  %2654 = vmatpush3.bf16.msra.mxu1 %v3256_v30 }
 0x142   :  { %921 = vmatprep.subr.bf16.mxu0 %v3105_v3  ;;  %2659 = vmatprep.subr.bf16.mxu1 %v3040_v5 }
 0x144   :  { %2236 = vmatmul.mubr.msk.bf16.vlgmr.msra.gmra.mrb[24].mxu0 %vm2235_vm14, %v3049_v38  ;;  %2656 = vmatmul.mubr.msk.bf16.vlgmr.msra.gmra.mrb[24].mxu1 %vm2235_vm14, %v3049_v38 }
 0x145   :  { %922 = vmatpush1.bf16.msra.mxu0 %v3112_v4  ;;  %2660 = vmatpush3.bf16.msra.mxu1 %v3119_v6 }
 0x146   :  { %923 = vmatprep.subr.bf16.mxu0 %v3125_v7  ;;  %2661 = vmatprep.subr.bf16.mxu1 %v3040_v5 }
 0x147   :  { %953 = vmatprep.mubr.bf16.mxu0 %v3038_v1  ;;  %2675 = vmatprep.mubr.msk.bf16.mxu1 %vm3044_vm0, %v3040_v5 }
 0x149   :  { %924 = vmatpush1.bf16.msra.mxu0 %v3130_v8  ;;  %2662 = vmatpush3.bf16.msra.mxu1 %v3137_v9 }
 0x14a   :  { %925 = vmatprep.subr.bf16.mxu0 %v3142_v12  ;;  %2663 = vmatprep.subr.bf16.mxu1 %v3040_v5 }
 0x14d   :  { %926 = vmatpush1.bf16.msra.mxu0 %v3151_v13  ;;  %2664 = vmatpush3.bf16.msra.mxu1 %v3158_v14 }
 0x14e   :  { %927 = vmatprep.subr.bf16.mxu0 %v3165_v15  ;;  %2665 = vmatprep.subr.bf16.mxu1 %v3040_v5 }
 0x151   :  { %928 = vmatpush1.bf16.msra.mxu0 %v3175_v17  ;;  %2666 = vmatpush3.bf16.msra.mxu1 %v3180_v18 }
 0x152   :  { %929 = vmatprep.subr.bf16.mxu0 %v3187_v19  ;;  %2667 = vmatprep.subr.bf16.mxu1 %v3040_v5 }
 0x155   :  { %930 = vmatpush1.bf16.msra.mxu0 %v3192_v20  ;;  %2668 = vmatpush3.bf16.msra.mxu1 %v3199_v21 }
 0x156   :  { %931 = vmatprep.subr.bf16.mxu0 %v3206_v22  ;;  %2669 = vmatprep.subr.bf16.mxu1 %v3040_v5 }
 0x157   :  { %v228_v51 = vpop.f32.mrb[0].mxu0  ;;  %v269_v52 = vpop.f32.mrb[0].mxu1 }
 0x158   :  { %v2334_v53 = vpack.c.bf16 %v269_v52, %v269_v52  ;;  %v230_v54 = vpop.f32.mrb[1].mxu0  ;;  %v2537_v55 = vpop.f32.mrb[1].mxu1 }
 0x159   :  { %v2333_v56 = vpack.c.bf16 %v230_v54, %v228_v51  ;;  %932 = vmatpush1.bf16.msra.mxu0 %v3213_v23  ;;  %2670 = vmatpush3.bf16.msra.mxu1 %v3218_v24  ;;  %v232_v57 = vpop.f32.mrb[2].mxu0  ;;  %v272_v58 = vpop.f32.mrb[2].mxu1 }
 0x15a   :  { %289 = vst [vmem:[#allocation2 + $0x8] sm:$0xf] %v2334_v53  ;;  %v233_v59 = vpop.f32.mrb[3].mxu0  ;;  %v2538_v60 = vpop.f32.mrb[3].mxu1  ;;  %933 = vmatprep.subr.bf16.mxu0 %v3225_v25  ;;  %2671 = vmatprep.subr.bf16.mxu1 %v3040_v5 }
 0x15b   :  { %288 = vst [vmem:[#allocation2] sm:$0xff] %v2333_v56  ;;  %v3768_v60 = vld [vmem:[%s4237_s3 + $0x78] ss:$12 sps:$4 sm:$0xff]  }
 0x15d   :  { %934 = vmatpush1.bf16.msra.mxu0 %v3232_v26  ;;  %2672 = vmatpush3.bf16.msra.mxu1 %v3237_v27 }
 0x15e   :  { %935 = vmatprep.subr.bf16.mxu0 %v3244_v28  ;;  %2673 = vmatprep.subr.bf16.mxu1 %v3040_v5 }
 0x161   :  { %936 = vmatpush1.bf16.msra.mxu0 %v3251_v29  ;;  %2674 = vmatpush3.bf16.msra.mxu1 %v3256_v30 }
 0x162   :  { %1025 = vmatprep.subr.bf16.mxu0 %v3105_v3  ;;  %2679 = vmatprep.subr.bf16.mxu1 %v3040_v5 }
 0x164   :  { %2243 = vmatmul.mubr.msk.bf16.vlgmr.msra.gmra.mrb[28].mxu0 %vm2242_vm1, %v3049_v38  ;;  %2676 = vmatmul.mubr.msk.bf16.vlgmr.msra.gmra.mrb[28].mxu1 %vm2242_vm1, %v3049_v38 }
 0x165   :  { %1026 = vmatpush1.bf16.msra.mxu0 %v3112_v4  ;;  %2680 = vmatpush3.bf16.msra.mxu1 %v3119_v6 }
 0x166   :  { %1027 = vmatprep.subr.bf16.mxu0 %v3125_v7  ;;  %2681 = vmatprep.subr.bf16.mxu1 %v3040_v5 }
 0x167   :  { %1057 = vmatprep.mubr.bf16.mxu0 %v3038_v1  ;;  %2695 = vmatprep.mubr.msk.bf16.mxu1 %vm3044_vm0, %v3040_v5 }
 0x169   :  { %1028 = vmatpush1.bf16.msra.mxu0 %v3130_v8  ;;  %2682 = vmatpush3.bf16.msra.mxu1 %v3137_v9 }
 0x16a   :  { %1029 = vmatprep.subr.bf16.mxu0 %v3142_v12  ;;  %2683 = vmatprep.subr.bf16.mxu1 %v3040_v5 }
 0x16d   :  { %1030 = vmatpush1.bf16.msra.mxu0 %v3151_v13  ;;  %2684 = vmatpush3.bf16.msra.mxu1 %v3158_v14 }
 0x16e   :  { %1031 = vmatprep.subr.bf16.mxu0 %v3165_v15  ;;  %2685 = vmatprep.subr.bf16.mxu1 %v3040_v5 }
 0x171   :  { %1032 = vmatpush1.bf16.msra.mxu0 %v3175_v17  ;;  %2686 = vmatpush3.bf16.msra.mxu1 %v3180_v18 }
 0x172   :  { %1033 = vmatprep.subr.bf16.mxu0 %v3187_v19  ;;  %2687 = vmatprep.subr.bf16.mxu1 %v3040_v5 }
 0x175   :  { %1034 = vmatpush1.bf16.msra.mxu0 %v3192_v20  ;;  %2688 = vmatpush3.bf16.msra.mxu1 %v3199_v21 }
 0x176   :  { %1035 = vmatprep.subr.bf16.mxu0 %v3206_v22  ;;  %2689 = vmatprep.subr.bf16.mxu1 %v3040_v5 }
 0x177   :  { %v331_v63 = vpop.f32.mrb[4].mxu0  ;;  %v372_v0 = vpop.f32.mrb[4].mxu1 }
 0x178   :  { %v2336_v2 = vpack.c.bf16 %v372_v0, %v372_v0  ;;  %v333_v10 = vpop.f32.mrb[5].mxu0  ;;  %v2557_v11 = vpop.f32.mrb[5].mxu1  ;;  %v3780_v0 = vld [vmem:[%s4237_s3 + $0x94] ss:$12 sps:$4 sm:$0xff]  }
 0x179   :  { %v2335_v16 = vpack.c.bf16 %v333_v10, %v331_v63  ;;  %v335_v31 = vpop.f32.mrb[6].mxu0  ;;  %v375_v32 = vpop.f32.mrb[6].mxu1  ;;  %1036 = vmatpush1.bf16.msra.mxu0 %v3213_v23  ;;  %2690 = vmatpush3.bf16.msra.mxu1 %v3218_v24  ;;  %v3787_v10 = vld [vmem:[%s4237_s3 + $0x90] ss:$12 sps:$4 sm:$0xff]   ;;  %v3793_v11 = vld [vmem:[%s4237_s3 + $0x98] ss:$12 sps:$4 sm:$0xff]  }
 0x17a   :  { %393 = vst [vmem:[#allocation2 + $0x14] sm:$0xf] %v2336_v2  ;;  %v336_v33 = vpop.f32.mrb[7].mxu0  ;;  %v2558_v34 = vpop.f32.mrb[7].mxu1  ;;  %1037 = vmatprep.subr.bf16.mxu0 %v3225_v25  ;;  %2691 = vmatprep.subr.bf16.mxu1 %v3040_v5  ;;  %v3807_v31 = vld [vmem:[%s4237_s3 + $0xa8] ss:$12 sps:$4 sm:$0xff]  }
 0x17b   :  { %392 = vst [vmem:[#allocation2 + $0xc] sm:$0xff] %v2335_v16  ;;  %v1332_v2 = vpop.permute.xlu0 %1331  ;;  %v3799_v16 = vld [vmem:[%s4237_s3 + $0xac] ss:$12 sps:$4 sm:$0xff]   ;;  %v3813_v32 = vld [vmem:[%s4237_s3 + $0xb0] ss:$12 sps:$4 sm:$0xff]  }
 0x17c   :  { %vm1333_vm8 = vcmp.eq.s32.totalorder %v1332_v2, %v3267_v35 }
 0x17d   :  { %1038 = vmatpush1.bf16.msra.mxu0 %v3232_v26  ;;  %2692 = vmatpush3.bf16.msra.mxu1 %v3237_v27  ;;  %vm2270_vm9 = vmpackc.low %vm1333_vm8, %vm1333_vm8 }
 0x17e   :  { %1039 = vmatprep.subr.bf16.mxu0 %v3244_v28  ;;  %2693 = vmatprep.subr.bf16.mxu1 %v3040_v5 }
 0x181   :  { %1040 = vmatpush1.bf16.msra.mxu0 %v3251_v29  ;;  %2694 = vmatpush3.bf16.msra.mxu1 %v3256_v30 }
 0x182   :  { %1129 = vmatprep.subr.bf16.mxu0 %v3105_v3  ;;  %2699 = vmatprep.subr.bf16.mxu1 %v3040_v5 }
 0x184   :  { %2250 = vmatmul.mubr.msk.bf16.vlgmr.msra.gmra.mrb[32].mxu0 %vm2249_vm3, %v3049_v38  ;;  %2696 = vmatmul.mubr.msk.bf16.vlgmr.msra.gmra.mrb[32].mxu1 %vm2249_vm3, %v3049_v38 }
 0x185   :  { %1130 = vmatpush1.bf16.msra.mxu0 %v3112_v4  ;;  %2700 = vmatpush3.bf16.msra.mxu1 %v3119_v6 }
 0x186   :  { %1131 = vmatprep.subr.bf16.mxu0 %v3125_v7  ;;  %2701 = vmatprep.subr.bf16.mxu1 %v3040_v5 }
 0x187   :  { %1161 = vmatprep.mubr.bf16.mxu0 %v3038_v1  ;;  %2715 = vmatprep.mubr.msk.bf16.mxu1 %vm3044_vm0, %v3040_v5 }
 0x189   :  { %1132 = vmatpush1.bf16.msra.mxu0 %v3130_v8  ;;  %2702 = vmatpush3.bf16.msra.mxu1 %v3137_v9 }
 0x18a   :  { %1133 = vmatprep.subr.bf16.mxu0 %v3142_v12  ;;  %2703 = vmatprep.subr.bf16.mxu1 %v3040_v5 }
 0x18d   :  { %1134 = vmatpush1.bf16.msra.mxu0 %v3151_v13  ;;  %2704 = vmatpush3.bf16.msra.mxu1 %v3158_v14 }
 0x18e   :  { %1135 = vmatprep.subr.bf16.mxu0 %v3165_v15  ;;  %2705 = vmatprep.subr.bf16.mxu1 %v3040_v5 }
 0x191   :  { %1136 = vmatpush1.bf16.msra.mxu0 %v3175_v17  ;;  %2706 = vmatpush3.bf16.msra.mxu1 %v3180_v18 }
 0x192   :  { %1137 = vmatprep.subr.bf16.mxu0 %v3187_v19  ;;  %2707 = vmatprep.subr.bf16.mxu1 %v3040_v5 }
 0x195   :  { %1138 = vmatpush1.bf16.msra.mxu0 %v3192_v20  ;;  %2708 = vmatpush3.bf16.msra.mxu1 %v3199_v21 }
 0x196   :  { %1139 = vmatprep.subr.bf16.mxu0 %v3206_v22  ;;  %2709 = vmatprep.subr.bf16.mxu1 %v3040_v5 }
 0x197   :  { %v435_v3 = vpop.f32.mrb[8].mxu0  ;;  %v476_v4 = vpop.f32.mrb[8].mxu1 }
 0x198   :  { %v2338_v6 = vpack.c.bf16 %v476_v4, %v476_v4  ;;  %v437_v7 = vpop.f32.mrb[9].mxu0  ;;  %v2577_v8 = vpop.f32.mrb[9].mxu1 }
 0x199   :  { %v2337_v9 = vpack.c.bf16 %v437_v7, %v435_v3  ;;  %v439_v12 = vpop.f32.mrb[10].mxu0  ;;  %v479_v37 = vpop.f32.mrb[10].mxu1  ;;  %1140 = vmatpush1.bf16.msra.mxu0 %v3213_v23  ;;  %2710 = vmatpush3.bf16.msra.mxu1 %v3218_v24 }
 0x19a   :  { %497 = vst [vmem:[#allocation2 + $0x20] sm:$0xf] %v2338_v6  ;;  %v440_v39 = vpop.f32.mrb[11].mxu0  ;;  %v2578_v40 = vpop.f32.mrb[11].mxu1  ;;  %1141 = vmatprep.subr.bf16.mxu0 %v3225_v25  ;;  %2711 = vmatprep.subr.bf16.mxu1 %v3040_v5 }
 0x19b   :  { %496 = vst [vmem:[#allocation2 + $0x18] sm:$0xff] %v2337_v9 }
 0x19d   :  { %1142 = vmatpush1.bf16.msra.mxu0 %v3232_v26  ;;  %2712 = vmatpush3.bf16.msra.mxu1 %v3237_v27 }
 0x19e   :  { %1143 = vmatprep.subr.bf16.mxu0 %v3244_v28  ;;  %2713 = vmatprep.subr.bf16.mxu1 %v3040_v5 }
 0x1a1   :  { %1144 = vmatpush1.bf16.msra.mxu0 %v3251_v29  ;;  %2714 = vmatpush3.bf16.msra.mxu1 %v3256_v30 }
 0x1a2   :  { %1233 = vmatprep.subr.bf16.mxu0 %v3623_v42  ;;  %2719 = vmatprep.subr.bf16.mxu1 %v3040_v5 }
 0x1a4   :  { %2257 = vmatmul.mubr.msk.bf16.vlgmr.msra.gmra.mrb[36].mxu0 %vm2256_vm5, %v3049_v38  ;;  %2716 = vmatmul.mubr.msk.bf16.vlgmr.msra.gmra.mrb[36].mxu1 %vm2256_vm5, %v3049_v38 }
 0x1a5   :  { %1234 = vmatpush1.bf16.msra.mxu0 %v3632_v43  ;;  %2720 = vmatpush3.bf16.msra.mxu1 %v3638_v44 }
 0x1a6   :  { %1235 = vmatprep.subr.bf16.mxu0 %v3644_v45  ;;  %2721 = vmatprep.subr.bf16.mxu1 %v3040_v5 }
 0x1a7   :  { %1265 = vmatprep.mubr.bf16.mxu0 %v3038_v1  ;;  %2735 = vmatprep.mubr.msk.bf16.mxu1 %vm3044_vm0, %v3040_v5 }
 0x1a9   :  { %1236 = vmatpush1.bf16.msra.mxu0 %v3654_v46  ;;  %2722 = vmatpush3.bf16.msra.mxu1 %v3660_v47 }
 0x1aa   :  { %1237 = vmatprep.subr.bf16.mxu0 %v3666_v48  ;;  %2723 = vmatprep.subr.bf16.mxu1 %v3040_v5 }
 0x1ad   :  { %1238 = vmatpush1.bf16.msra.mxu0 %v3151_v13  ;;  %2724 = vmatpush3.bf16.msra.mxu1 %v3158_v14 }
 0x1ae   :  { %1239 = vmatprep.subr.bf16.mxu0 %v3165_v15  ;;  %2725 = vmatprep.subr.bf16.mxu1 %v3040_v5 }
 0x1b1   :  { %1240 = vmatpush1.bf16.msra.mxu0 %v3175_v17  ;;  %2726 = vmatpush3.bf16.msra.mxu1 %v3180_v18 }
 0x1b2   :  { %1241 = vmatprep.subr.bf16.mxu0 %v3187_v19  ;;  %2727 = vmatprep.subr.bf16.mxu1 %v3040_v5 }
 0x1b5   :  { %1242 = vmatpush1.bf16.msra.mxu0 %v3192_v20  ;;  %2728 = vmatpush3.bf16.msra.mxu1 %v3199_v21  ;;  %v1228_v21 = vpop.permute.xlu1 %1227 }
 0x1b6   :  { %1243 = vmatprep.subr.bf16.mxu0 %v3206_v22  ;;  %2729 = vmatprep.subr.bf16.mxu1 %v3040_v5  ;;  %vm1229_vm6 = vcmp.eq.s32.totalorder %v1228_v21, %v3267_v35  ;;  %v3711_v22 = vld [vmem:[%s4237_s3 + $0x30] ss:$12 sps:$4 sm:$0xff]  }
 0x1b7   :  { %v539_v13 = vpop.f32.mrb[12].mxu0  ;;  %v580_v14 = vpop.f32.mrb[12].mxu1  ;;  %vm2263_vm7 = vmpackc.low %vm1229_vm6, %vm1229_vm6 }
 0x1b8   :  { %v2340_v15 = vpack.c.bf16 %v580_v14, %v580_v14  ;;  %v541_v49 = vpop.f32.mrb[13].mxu0  ;;  %v2597_v50 = vpop.f32.mrb[13].mxu1 }
 0x1b9   :  { %v2339_v17 = vpack.c.bf16 %v541_v49, %v539_v13  ;;  %v543_v51 = vpop.f32.mrb[14].mxu0  ;;  %v583_v18 = vpop.f32.mrb[14].mxu1  ;;  %1244 = vmatpush1.bf16.msra.mxu0 %v3213_v23  ;;  %2730 = vmatpush3.bf16.msra.mxu1 %v3218_v24  ;;  %v3717_v23 = vld [vmem:[%s4237_s3 + $0x38] ss:$12 sps:$4 sm:$0xff]  }
 0x1ba   :  { %601 = vst [vmem:[#allocation2 + $0x2c] sm:$0xf] %v2340_v15  ;;  %v544_v19 = vpop.f32.mrb[15].mxu0  ;;  %v2598_v20 = vpop.f32.mrb[15].mxu1  ;;  %1245 = vmatprep.subr.bf16.mxu0 %v3225_v25  ;;  %2731 = vmatprep.subr.bf16.mxu1 %v3040_v5  ;;  %v3723_v24 = vld [vmem:[%s4237_s3 + $0x4c] ss:$12 sps:$4 sm:$0xff]  }
 0x1bb   :  { %600 = vst [vmem:[#allocation2 + $0x24] sm:$0xff] %v2339_v17  ;;  %v3730_v25 = vld [vmem:[%s4237_s3 + $0x48] ss:$12 sps:$4 sm:$0xff]   ;;  %v1436_v37 = vpop.permute.xlu1 %1435 }
 0x1bc   :  { %vm1437_vm10 = vcmp.eq.s32.totalorder %v1436_v37, %v3267_v35 }
 0x1bd   :  { %1246 = vmatpush1.bf16.msra.mxu0 %v3232_v26  ;;  %2732 = vmatpush3.bf16.msra.mxu1 %v3237_v27  ;;  %v3736_v26 = vld [vmem:[%s4237_s3 + $0x50] ss:$12 sps:$4 sm:$0xff]   ;;  %vm2277_vm11 = vmpackc.low %vm1437_vm10, %vm1437_vm10 }
 0x1be   :  { %1247 = vmatprep.subr.bf16.mxu0 %v3244_v28  ;;  %2733 = vmatprep.subr.bf16.mxu1 %v3040_v5  ;;  %v3742_v27 = vld [vmem:[%s4237_s3 + $0x64] ss:$12 sps:$4 sm:$0xff]   ;;  %v3749_v28 = vld [vmem:[%s4237_s3 + $0x60] ss:$12 sps:$4 sm:$0xff]  }
 0x1bf   :  { %v1540_v18 = vpop.permute.xlu1 %1539 }
 0x1c0   :  { %vm1541_vm12 = vcmp.eq.s32.totalorder %v1540_v18, %v3267_v35  ;;  %v4023_v18 = vld [vmem:[%s4238_s4 + $0x38] sm:$0xf] }
 0x1c1   :  { %1248 = vmatpush1.bf16.msra.mxu0 %v3251_v29  ;;  %2734 = vmatpush3.bf16.msra.mxu1 %v3256_v30  ;;  %v3755_v29 = vld [vmem:[%s4237_s3 + $0x68] ss:$12 sps:$4 sm:$0xff]   ;;  %vm2284_vm13 = vmpackc.low %vm1541_vm12, %vm1541_vm12 }
 0x1c2   :  { %1337 = vmatprep.subr.bf16.mxu0 %v3623_v42  ;;  %2739 = vmatprep.subr.bf16.mxu1 %v3040_v5  ;;  %v3761_v30 = vld [vmem:[%s4237_s3 + $0x7c] ss:$12 sps:$4 sm:$0xff]  }
 0x1c4   :  { %2264 = vmatmul.mubr.msk.bf16.vlgmr.msra.gmra.mrb[40].mxu0 %vm2263_vm7, %v3049_v38  ;;  %2736 = vmatmul.mubr.msk.bf16.vlgmr.msra.gmra.mrb[40].mxu1 %vm2263_vm7, %v3049_v38 }
 0x1c5   :  { %1338 = vmatpush1.bf16.msra.mxu0 %v3632_v43  ;;  %2740 = vmatpush3.bf16.msra.mxu1 %v3638_v44 }
 0x1c6   :  { %1339 = vmatprep.subr.bf16.mxu0 %v3644_v45  ;;  %2741 = vmatprep.subr.bf16.mxu1 %v3040_v5 }
 0x1c7   :  { %1369 = vmatprep.mubr.bf16.mxu0 %v3038_v1  ;;  %2755 = vmatprep.mubr.msk.bf16.mxu1 %vm3044_vm0, %v3040_v5 }
 0x1c9   :  { %1340 = vmatpush1.bf16.msra.mxu0 %v3654_v46  ;;  %2742 = vmatpush3.bf16.msra.mxu1 %v3660_v47 }
 0x1ca   :  { %1341 = vmatprep.subr.bf16.mxu0 %v3666_v48  ;;  %2743 = vmatprep.subr.bf16.mxu1 %v3040_v5 }
 0x1cd   :  { %1342 = vmatpush1.bf16.msra.mxu0 %v3711_v22  ;;  %2744 = vmatpush3.bf16.msra.mxu1 %v3717_v23 }
 0x1ce   :  { %1343 = vmatprep.subr.bf16.mxu0 %v3723_v24  ;;  %2745 = vmatprep.subr.bf16.mxu1 %v3040_v5 }
 0x1d1   :  { %1344 = vmatpush1.bf16.msra.mxu0 %v3730_v25  ;;  %2746 = vmatpush3.bf16.msra.mxu1 %v3736_v26 }
 0x1d2   :  { %1345 = vmatprep.subr.bf16.mxu0 %v3742_v27  ;;  %2747 = vmatprep.subr.bf16.mxu1 %v3040_v5 }
 0x1d5   :  { %1346 = vmatpush1.bf16.msra.mxu0 %v3749_v28  ;;  %2748 = vmatpush3.bf16.msra.mxu1 %v3755_v29 }
 0x1d6   :  { %1347 = vmatprep.subr.bf16.mxu0 %v3761_v30  ;;  %2749 = vmatprep.subr.bf16.mxu1 %v3040_v5 }
 0x1d7   :  { %v643_v52 = vpop.f32.mrb[16].mxu0  ;;  %v684_v53 = vpop.f32.mrb[16].mxu1 }
 0x1d8   :  { %v2342_v54 = vpack.c.bf16 %v684_v53, %v684_v53  ;;  %v645_v55 = vpop.f32.mrb[17].mxu0  ;;  %v2617_v56 = vpop.f32.mrb[17].mxu1 }
 0x1d9   :  { %v2341_v57 = vpack.c.bf16 %v645_v55, %v643_v52  ;;  %v647_v58 = vpop.f32.mrb[18].mxu0  ;;  %v687_v59 = vpop.f32.mrb[18].mxu1  ;;  %1348 = vmatpush1.bf16.msra.mxu0 %v3768_v60  ;;  %2750 = vmatpush3.bf16.msra.mxu1 %v3774_v61 }
 0x1da   :  { %705 = vst [vmem:[#allocation2 + $0x38] sm:$0xf] %v2342_v54  ;;  %v648_v62 = vpop.f32.mrb[19].mxu0  ;;  %v2618_v63 = vpop.f32.mrb[19].mxu1  ;;  %1349 = vmatprep.subr.bf16.mxu0 %v3780_v0  ;;  %2751 = vmatprep.subr.bf16.mxu1 %v3040_v5 }
 0x1db   :  { %704 = vst [vmem:[#allocation2 + $0x30] sm:$0xff] %v2341_v57  ;;  %v1644_v59 = vpop.permute.xlu0 %1643  ;;  %v1889_v62 = vld [vmem:[%s4236_s2] sm:$0xff] }
 0x1dc   :  { %1891 = vperm.xlu1 %2922, %v1889_v62   ;;  %vm1645_vm14 = vcmp.eq.s32.totalorder %v1644_v59, %v3267_v35  ;;  %v4078_v59 = vld [vmem:[%s4238_s4 + $0x78] sm:$0xff]  ;;  %v4083_v62 = vld [vmem:[%s4238_s4 + $0x80] sm:$0xf] }
 0x1dd   :  { %1350 = vmatpush1.bf16.msra.mxu0 %v3787_v10  ;;  %2752 = vmatpush3.bf16.msra.mxu1 %v3793_v11  ;;  %vm2291_vm15 = vmpackc.low %vm1645_vm14, %vm1645_vm14 }
 0x1de   :  { %1351 = vmatprep.subr.bf16.mxu0 %v3799_v16  ;;  %2753 = vmatprep.subr.bf16.mxu1 %v3040_v5 }
 0x1e1   :  { %1352 = vmatpush1.bf16.msra.mxu0 %v3807_v31  ;;  %2754 = vmatpush3.bf16.msra.mxu1 %v3813_v32 }
 0x1e2   :  { %1441 = vmatprep.subr.bf16.mxu0 %v3623_v42  ;;  %2759 = vmatprep.subr.bf16.mxu1 %v3040_v5 }
 0x1e4   :  { %2271 = vmatmul.mubr.msk.bf16.vlgmr.msra.gmra.mrb[44].mxu0 %vm2270_vm9, %v3049_v38  ;;  %2756 = vmatmul.mubr.msk.bf16.vlgmr.msra.gmra.mrb[44].mxu1 %vm2270_vm9, %v3049_v38 }
 0x1e5   :  { %1442 = vmatpush1.bf16.msra.mxu0 %v3632_v43  ;;  %2760 = vmatpush3.bf16.msra.mxu1 %v3638_v44 }
 0x1e6   :  { %1443 = vmatprep.subr.bf16.mxu0 %v3644_v45  ;;  %2761 = vmatprep.subr.bf16.mxu1 %v3040_v5 }
 0x1e7   :  { %1473 = vmatprep.mubr.bf16.mxu0 %v3038_v1  ;;  %2775 = vmatprep.mubr.msk.bf16.mxu1 %vm3044_vm0, %v3040_v5 }
 0x1e9   :  { %1444 = vmatpush1.bf16.msra.mxu0 %v3654_v46  ;;  %2762 = vmatpush3.bf16.msra.mxu1 %v3660_v47 }
 0x1ea   :  { %1445 = vmatprep.subr.bf16.mxu0 %v3666_v48  ;;  %2763 = vmatprep.subr.bf16.mxu1 %v3040_v5 }
 0x1ed   :  { %1446 = vmatpush1.bf16.msra.mxu0 %v3711_v22  ;;  %2764 = vmatpush3.bf16.msra.mxu1 %v3717_v23 }
 0x1ee   :  { %1447 = vmatprep.subr.bf16.mxu0 %v3723_v24  ;;  %2765 = vmatprep.subr.bf16.mxu1 %v3040_v5 }
 0x1f1   :  { %1448 = vmatpush1.bf16.msra.mxu0 %v3730_v25  ;;  %2766 = vmatpush3.bf16.msra.mxu1 %v3736_v26 }
 0x1f2   :  { %1449 = vmatprep.subr.bf16.mxu0 %v3742_v27  ;;  %2767 = vmatprep.subr.bf16.mxu1 %v3040_v5 }
 0x1f5   :  { %1450 = vmatpush1.bf16.msra.mxu0 %v3749_v28  ;;  %2768 = vmatpush3.bf16.msra.mxu1 %v3755_v29 }
 0x1f6   :  { %1451 = vmatprep.subr.bf16.mxu0 %v3761_v30  ;;  %2769 = vmatprep.subr.bf16.mxu1 %v3040_v5 }
 0x1f7   :  { %v747_v33 = vpop.f32.mrb[20].mxu0  ;;  %v788_v34 = vpop.f32.mrb[20].mxu1 }
 0x1f8   :  { %v2344_v36 = vpack.c.bf16 %v788_v34, %v788_v34  ;;  %v749_v3 = vpop.f32.mrb[21].mxu0  ;;  %v2637_v4 = vpop.f32.mrb[21].mxu1 }
 0x1f9   :  { %v2343_v6 = vpack.c.bf16 %v749_v3, %v747_v33  ;;  %v751_v7 = vpop.f32.mrb[22].mxu0  ;;  %v791_v8 = vpop.f32.mrb[22].mxu1  ;;  %1452 = vmatpush1.bf16.msra.mxu0 %v3768_v60  ;;  %2770 = vmatpush3.bf16.msra.mxu1 %v3774_v61 }
 0x1fa   :  { %809 = vst [vmem:[#allocation2 + $0x44] sm:$0xf] %v2344_v36  ;;  %v752_v9 = vpop.f32.mrb[23].mxu0  ;;  %v2638_v12 = vpop.f32.mrb[23].mxu1  ;;  %1453 = vmatprep.subr.bf16.mxu0 %v3780_v0  ;;  %2771 = vmatprep.subr.bf16.mxu1 %v3040_v5 }
 0x1fb   :  { %808 = vst [vmem:[#allocation2 + $0x3c] sm:$0xff] %v2343_v6 }
 0x1fd   :  { %1454 = vmatpush1.bf16.msra.mxu0 %v3787_v10  ;;  %2772 = vmatpush3.bf16.msra.mxu1 %v3793_v11 }
 0x1fe   :  { %1455 = vmatprep.subr.bf16.mxu0 %v3799_v16  ;;  %2773 = vmatprep.subr.bf16.mxu1 %v3040_v5 }
 0x201   :  { %1456 = vmatpush1.bf16.msra.mxu0 %v3807_v31  ;;  %2774 = vmatpush3.bf16.msra.mxu1 %v3813_v32 }
 0x202   :  { %1545 = vmatprep.subr.bf16.mxu0 %v3623_v42  ;;  %2779 = vmatprep.subr.bf16.mxu1 %v3040_v5 }
 0x204   :  { %2278 = vmatmul.mubr.msk.bf16.vlgmr.msra.gmra.mrb[48].mxu0 %vm2277_vm11, %v3049_v38  ;;  %2776 = vmatmul.mubr.msk.bf16.vlgmr.msra.gmra.mrb[48].mxu1 %vm2277_vm11, %v3049_v38 }
 0x205   :  { %1546 = vmatpush1.bf16.msra.mxu0 %v3632_v43  ;;  %2780 = vmatpush3.bf16.msra.mxu1 %v3638_v44 }
 0x206   :  { %1547 = vmatprep.subr.bf16.mxu0 %v3644_v45  ;;  %2781 = vmatprep.subr.bf16.mxu1 %v3040_v5 }
 0x207   :  { %1577 = vmatprep.mubr.bf16.mxu0 %v3038_v1  ;;  %2795 = vmatprep.mubr.msk.bf16.mxu1 %vm3044_vm0, %v3040_v5 }
 0x209   :  { %1548 = vmatpush1.bf16.msra.mxu0 %v3654_v46  ;;  %2782 = vmatpush3.bf16.msra.mxu1 %v3660_v47 }
 0x20a   :  { %1549 = vmatprep.subr.bf16.mxu0 %v3666_v48  ;;  %2783 = vmatprep.subr.bf16.mxu1 %v3040_v5 }
 0x20d   :  { %1550 = vmatpush1.bf16.msra.mxu0 %v3711_v22  ;;  %2784 = vmatpush3.bf16.msra.mxu1 %v3717_v23 }
 0x20e   :  { %1551 = vmatprep.subr.bf16.mxu0 %v3723_v24  ;;  %2785 = vmatprep.subr.bf16.mxu1 %v3040_v5 }
 0x211   :  { %1552 = vmatpush1.bf16.msra.mxu0 %v3730_v25  ;;  %2786 = vmatpush3.bf16.msra.mxu1 %v3736_v26 }
 0x212   :  { %1553 = vmatprep.subr.bf16.mxu0 %v3742_v27  ;;  %2787 = vmatprep.subr.bf16.mxu1 %v3040_v5 }
 0x215   :  { %1554 = vmatpush1.bf16.msra.mxu0 %v3749_v28  ;;  %2788 = vmatpush3.bf16.msra.mxu1 %v3755_v29 }
 0x216   :  { %1555 = vmatprep.subr.bf16.mxu0 %v3761_v30  ;;  %2789 = vmatprep.subr.bf16.mxu1 %v3040_v5 }
 0x217   :  { %v851_v39 = vpop.f32.mrb[24].mxu0  ;;  %v892_v40 = vpop.f32.mrb[24].mxu1 }
 0x218   :  { %v2346_v41 = vpack.c.bf16 %v892_v40, %v892_v40  ;;  %v853_v13 = vpop.f32.mrb[25].mxu0  ;;  %v2657_v14 = vpop.f32.mrb[25].mxu1  ;;  %v3978_v40 = vld [vmem:[%s4238_s4] sm:$0xff] }
 0x219   :  { %v2345_v15 = vpack.c.bf16 %v853_v13, %v851_v39  ;;  %v855_v49 = vpop.f32.mrb[26].mxu0  ;;  %v895_v50 = vpop.f32.mrb[26].mxu1  ;;  %1556 = vmatpush1.bf16.msra.mxu0 %v3768_v60  ;;  %2790 = vmatpush3.bf16.msra.mxu1 %v3774_v61  ;;  %v3988_v13 = vld [vmem:[%s4238_s4 + $0xc] sm:$0xff]  ;;  %v3993_v14 = vld [vmem:[%s4238_s4 + $0x14] sm:$0xf] }
 0x21a   :  { %913 = vst [vmem:[#allocation2 + $0x50] sm:$0xf] %v2346_v41  ;;  %v856_v17 = vpop.f32.mrb[27].mxu0  ;;  %v2658_v51 = vpop.f32.mrb[27].mxu1  ;;  %1557 = vmatprep.subr.bf16.mxu0 %v3780_v0  ;;  %2791 = vmatprep.subr.bf16.mxu1 %v3040_v5  ;;  %v3983_v41 = vld [vmem:[%s4238_s4 + $0x8] sm:$0xf] }
 0x21b   :  { %912 = vst [vmem:[#allocation2 + $0x48] sm:$0xff] %v2345_v15  ;;  %v3998_v15 = vld [vmem:[%s4238_s4 + $0x18] sm:$0xff]  ;;  %v4003_v49 = vld [vmem:[%s4238_s4 + $0x20] sm:$0xf]  ;;  %v4008_v50 = vld [vmem:[%s4238_s4 + $0x24] sm:$0xff] }
 0x21c   :  { %v4013_v17 = vld [vmem:[%s4238_s4 + $0x2c] sm:$0xf]  ;;  %v4018_v51 = vld [vmem:[%s4238_s4 + $0x30] sm:$0xff] }
 0x21d   :  { %1558 = vmatpush1.bf16.msra.mxu0 %v3787_v10  ;;  %2792 = vmatpush3.bf16.msra.mxu1 %v3793_v11 }
 0x21e   :  { %1559 = vmatprep.subr.bf16.mxu0 %v3799_v16  ;;  %2793 = vmatprep.subr.bf16.mxu1 %v3040_v5 }
 0x221   :  { %1560 = vmatpush1.bf16.msra.mxu0 %v3807_v31  ;;  %2794 = vmatpush3.bf16.msra.mxu1 %v3813_v32 }
 0x222   :  { %1649 = vmatprep.subr.bf16.mxu0 %v3623_v42  ;;  %2799 = vmatprep.subr.bf16.mxu1 %v3040_v5 }
 0x224   :  { %2285 = vmatmul.mubr.msk.bf16.vlgmr.msra.gmra.mrb[52].mxu0 %vm2284_vm13, %v3049_v38  ;;  %2796 = vmatmul.mubr.msk.bf16.vlgmr.msra.gmra.mrb[52].mxu1 %vm2284_vm13, %v3049_v38 }
 0x225   :  { %1650 = vmatpush1.bf16.msra.mxu0 %v3632_v43  ;;  %2800 = vmatpush3.bf16.msra.mxu1 %v3638_v44 }
 0x226   :  { %1651 = vmatprep.subr.bf16.mxu0 %v3644_v45  ;;  %2801 = vmatprep.subr.bf16.mxu1 %v3040_v5 }
 0x227   :  { %1681 = vmatprep.mubr.bf16.mxu0 %v3038_v1  ;;  %2815 = vmatprep.mubr.msk.bf16.mxu1 %vm3044_vm0, %v3040_v5 }
 0x229   :  { %1652 = vmatpush1.bf16.msra.mxu0 %v3654_v46  ;;  %2802 = vmatpush3.bf16.msra.mxu1 %v3660_v47 }
 0x22a   :  { %1653 = vmatprep.subr.bf16.mxu0 %v3666_v48  ;;  %2803 = vmatprep.subr.bf16.mxu1 %v3040_v5 }
 0x22d   :  { %1654 = vmatpush1.bf16.msra.mxu0 %v3711_v22  ;;  %2804 = vmatpush3.bf16.msra.mxu1 %v3717_v23 }
 0x22e   :  { %1655 = vmatprep.subr.bf16.mxu0 %v3723_v24  ;;  %2805 = vmatprep.subr.bf16.mxu1 %v3040_v5 }
 0x231   :  { %1656 = vmatpush1.bf16.msra.mxu0 %v3730_v25  ;;  %2806 = vmatpush3.bf16.msra.mxu1 %v3736_v26 }
 0x232   :  { %1657 = vmatprep.subr.bf16.mxu0 %v3742_v27  ;;  %2807 = vmatprep.subr.bf16.mxu1 %v3040_v5 }
 0x235   :  { %1658 = vmatpush1.bf16.msra.mxu0 %v3749_v28  ;;  %2808 = vmatpush3.bf16.msra.mxu1 %v3755_v29 }
 0x236   :  { %1659 = vmatprep.subr.bf16.mxu0 %v3761_v30  ;;  %2809 = vmatprep.subr.bf16.mxu1 %v3040_v5 }
 0x237   :  { %v955_v19 = vpop.f32.mrb[28].mxu0  ;;  %v996_v20 = vpop.f32.mrb[28].mxu1 }
 0x238   :  { %v2348_v21 = vpack.c.bf16 %v996_v20, %v996_v20  ;;  %v957_v52 = vpop.f32.mrb[29].mxu0  ;;  %v2677_v53 = vpop.f32.mrb[29].mxu1  ;;  %v4033_v20 = vld [vmem:[%s4238_s4 + $0x44] sm:$0xf] }
 0x239   :  { %v2347_v54 = vpack.c.bf16 %v957_v52, %v955_v19  ;;  %v959_v55 = vpop.f32.mrb[30].mxu0  ;;  %v999_v56 = vpop.f32.mrb[30].mxu1  ;;  %1660 = vmatpush1.bf16.msra.mxu0 %v3768_v60  ;;  %2810 = vmatpush3.bf16.msra.mxu1 %v3774_v61  ;;  %v4028_v19 = vld [vmem:[%s4238_s4 + $0x3c] sm:$0xff]  ;;  %v4043_v52 = vld [vmem:[%s4238_s4 + $0x50] sm:$0xf]  ;;  %v4048_v53 = vld [vmem:[%s4238_s4 + $0x54] sm:$0xff] }
 0x23a   :  { %1017 = vst [vmem:[#allocation2 + $0x5c] sm:$0xf] %v2348_v21  ;;  %v960_v57 = vpop.f32.mrb[31].mxu0  ;;  %v2678_v58 = vpop.f32.mrb[31].mxu1  ;;  %1661 = vmatprep.subr.bf16.mxu0 %v3780_v0  ;;  %2811 = vmatprep.subr.bf16.mxu1 %v3040_v5  ;;  %v4038_v21 = vld [vmem:[%s4238_s4 + $0x48] sm:$0xff]  ;;  %v4058_v55 = vld [vmem:[%s4238_s4 + $0x60] sm:$0xff] }
 0x23b   :  { %1016 = vst [vmem:[#allocation2 + $0x54] sm:$0xff] %v2347_v54  ;;  %v4053_v54 = vld [vmem:[%s4238_s4 + $0x5c] sm:$0xf]  ;;  %v4063_v56 = vld [vmem:[%s4238_s4 + $0x68] sm:$0xf]  ;;  %v4068_v57 = vld [vmem:[%s4238_s4 + $0x6c] sm:$0xff] }
 0x23c   :  { %v4073_v58 = vld [vmem:[%s4238_s4 + $0x74] sm:$0xf] }
 0x23d   :  { %1662 = vmatpush1.bf16.msra.mxu0 %v3787_v10  ;;  %2812 = vmatpush3.bf16.msra.mxu1 %v3793_v11 }
 0x23e   :  { %1663 = vmatprep.subr.bf16.mxu0 %v3799_v16  ;;  %2813 = vmatprep.subr.bf16.mxu1 %v3040_v5 }
 0x241   :  { %1664 = vmatpush1.bf16.msra.mxu0 %v3807_v31  ;;  %2814 = vmatpush3.bf16.msra.mxu1 %v3813_v32 }
 0x242   :  { %1753 = vmatprep.subr.bf16.mxu0 %v3623_v42  ;;  %2819 = vmatprep.subr.bf16.mxu1 %v3040_v5 }
 0x244   :  { %2292 = vmatmul.mubr.msk.bf16.vlgmr.msra.gmra.mrb[56].mxu0 %vm2291_vm15, %v3049_v38  ;;  %2816 = vmatmul.mubr.msk.bf16.vlgmr.msra.gmra.mrb[56].mxu1 %vm2291_vm15, %v3049_v38 }
 0x245   :  { %1754 = vmatpush1.bf16.msra.mxu0 %v3632_v43  ;;  %2820 = vmatpush3.bf16.msra.mxu1 %v3638_v44 }
 0x246   :  { %1755 = vmatprep.subr.bf16.mxu0 %v3644_v45  ;;  %2821 = vmatprep.subr.bf16.mxu1 %v3040_v5 }
 0x247   :  { %1785 = vmatprep.mubr.bf16.mxu0 %v3038_v1  ;;  %2835 = vmatprep.mubr.msk.bf16.mxu1 %vm3044_vm0, %v3040_v5 }
 0x249   :  { %1756 = vmatpush1.bf16.msra.mxu0 %v3654_v46  ;;  %2822 = vmatpush3.bf16.msra.mxu1 %v3660_v47 }
 0x24a   :  { %1757 = vmatprep.subr.bf16.mxu0 %v3666_v48  ;;  %2823 = vmatprep.subr.bf16.mxu1 %v3040_v5 }
 0x24d   :  { %1758 = vmatpush1.bf16.msra.mxu0 %v3711_v22  ;;  %2824 = vmatpush3.bf16.msra.mxu1 %v3717_v23 }
 0x24e   :  { %1759 = vmatprep.subr.bf16.mxu0 %v3723_v24  ;;  %2825 = vmatprep.subr.bf16.mxu1 %v3040_v5  ;;  %v1748_v24 = vpop.permute.xlu1 %1747 }
 0x24f   :  { %vm1749_vm0 = vcmp.eq.s32.totalorder %v1748_v24, %v3267_v35  ;;  %v4138_v24 = vld [vmem:[%s4239_s5] ss:$0 sm:$0xff] }
 0x250   :  { %vm2298_vm1 = vmpackc.low %vm1749_vm0, %vm1749_vm0 }
 0x251   :  { %1760 = vmatpush1.bf16.msra.mxu0 %v3730_v25  ;;  %2826 = vmatpush3.bf16.msra.mxu1 %v3736_v26 }
 0x252   :  { %1761 = vmatprep.subr.bf16.mxu0 %v3742_v27  ;;  %2827 = vmatprep.subr.bf16.mxu1 %v3040_v5 }
 0x255   :  { %1762 = vmatpush1.bf16.msra.mxu0 %v3749_v28  ;;  %2828 = vmatpush3.bf16.msra.mxu1 %v3755_v29 }
 0x256   :  { %1763 = vmatprep.subr.bf16.mxu0 %v3761_v30  ;;  %2829 = vmatprep.subr.bf16.mxu1 %v3040_v5 }
 0x257   :  { %v1059_v1 = vpop.f32.mrb[32].mxu0  ;;  %v1100_v42 = vpop.f32.mrb[32].mxu1 }
 0x258   :  { %v2350_v43 = vpack.c.bf16 %v1100_v42, %v1100_v42  ;;  %v1061_v44 = vpop.f32.mrb[33].mxu0  ;;  %v2697_v45 = vpop.f32.mrb[33].mxu1  ;;  %v4093_v42 = vld [vmem:[%s4238_s4 + $0x8c] sm:$0xf] }
 0x259   :  { %v2349_v46 = vpack.c.bf16 %v1061_v44, %v1059_v1  ;;  %v1063_v47 = vpop.f32.mrb[34].mxu0  ;;  %v1103_v48 = vpop.f32.mrb[34].mxu1  ;;  %1764 = vmatpush1.bf16.msra.mxu0 %v3768_v60  ;;  %2830 = vmatpush3.bf16.msra.mxu1 %v3774_v61  ;;  %v4088_v1 = vld [vmem:[%s4238_s4 + $0x84] sm:$0xff]  ;;  %v4103_v44 = vld [vmem:[%s4238_s4 + $0x98] sm:$0xf]  ;;  %v4108_v45 = vld [vmem:[%s4238_s4 + $0x9c] sm:$0xff] }
 0x25a   :  { %1121 = vst [vmem:[#allocation2 + $0x68] sm:$0xf] %v2350_v43  ;;  %v1064_v22 = vpop.f32.mrb[35].mxu0  ;;  %v2698_v23 = vpop.f32.mrb[35].mxu1  ;;  %1765 = vmatprep.subr.bf16.mxu0 %v3780_v0  ;;  %2831 = vmatprep.subr.bf16.mxu1 %v3040_v5  ;;  %v4098_v43 = vld [vmem:[%s4238_s4 + $0x90] sm:$0xff]  ;;  %v4118_v47 = vld [vmem:[%s4238_s4 + $0xa8] sm:$0xff] }
 0x25b   :  { %1120 = vst [vmem:[#allocation2 + $0x60] sm:$0xff] %v2349_v46  ;;  %v3973_v39 = vpop.permute.xlu1 %1891  ;;  %v4113_v46 = vld [vmem:[%s4238_s4 + $0xa4] sm:$0xf]  ;;  %v4123_v48 = vld [vmem:[%s4238_s4 + $0xb0] sm:$0xf]  ;;  %v4128_v22 = vld [vmem:[%s4238_s4 + $0xb4] sm:$0xff] }
 0x25c   :  { %v4133_v23 = vld [vmem:[%s4238_s4 + $0xbc] sm:$0xf] }
 0x25d   :  { %1766 = vmatpush1.bf16.msra.mxu0 %v3787_v10  ;;  %2832 = vmatpush3.bf16.msra.mxu1 %v3793_v11 }
 0x25e   :  { %1767 = vmatprep.subr.bf16.mxu0 %v3799_v16  ;;  %2833 = vmatprep.subr.bf16.mxu1 %v3040_v5 }
 0x261   :  { %1768 = vmatpush1.bf16.msra.mxu0 %v3807_v31  ;;  %2834 = vmatpush3.bf16.msra.mxu1 %v3813_v32 }
 0x264   :  { %2299 = vmatmul.mubr.msk.bf16.vlgmr.msra.gmra.mrb[60].mxu0 %vm2298_vm1, %v3049_v38  ;;  %2836 = vmatmul.mubr.msk.bf16.vlgmr.msra.gmra.mrb[60].mxu1 %vm2298_vm1, %v3049_v38 }
 0x277   :  { %v1163_v25 = vpop.f32.mrb[36].mxu0  ;;  %v1204_v26 = vpop.f32.mrb[36].mxu1 }
 0x278   :  { %v2352_v27 = vpack.c.bf16 %v1204_v26, %v1204_v26  ;;  %v1165_v28 = vpop.f32.mrb[37].mxu0  ;;  %v2717_v29 = vpop.f32.mrb[37].mxu1 }
 0x279   :  { %v2351_v30 = vpack.c.bf16 %v1165_v28, %v1163_v25  ;;  %v1167_v60 = vpop.f32.mrb[38].mxu0  ;;  %v1207_v61 = vpop.f32.mrb[38].mxu1 }
 0x27a   :  { %1225 = vst [vmem:[#allocation2 + $0x74] sm:$0xf] %v2352_v27  ;;  %v1168_v5 = vpop.f32.mrb[39].mxu0  ;;  %v2718_v35 = vpop.f32.mrb[39].mxu1 }
 0x27b   :  { %1224 = vst [vmem:[#allocation2 + $0x6c] sm:$0xff] %v2351_v30 }
 0x297   :  { %v1267_v63 = vpop.f32.mrb[40].mxu0  ;;  %v1308_v0 = vpop.f32.mrb[40].mxu1 }
 0x298   :  { %v2354_v2 = vpack.c.bf16 %v1308_v0, %v1308_v0  ;;  %v1269_v10 = vpop.f32.mrb[41].mxu0  ;;  %v2737_v11 = vpop.f32.mrb[41].mxu1 }
 0x299   :  { %v2353_v16 = vpack.c.bf16 %v1269_v10, %v1267_v63  ;;  %v1271_v31 = vpop.f32.mrb[42].mxu0  ;;  %v1311_v38 = vpop.f32.mrb[42].mxu1 }
 0x29a   :  { %1329 = vst [vmem:[#allocation2 + $0x80] sm:$0xf] %v2354_v2  ;;  %v1272_v32 = vpop.f32.mrb[43].mxu0  ;;  %v2738_v33 = vpop.f32.mrb[43].mxu1 }
 0x29b   :  { %1328 = vst [vmem:[#allocation2 + $0x78] sm:$0xff] %v2353_v16 }
 0x2b7   :  { %v1371_v34 = vpop.f32.mrb[44].mxu0  ;;  %v1412_v36 = vpop.f32.mrb[44].mxu1 }
 0x2b8   :  { %v2356_v3 = vpack.c.bf16 %v1412_v36, %v1412_v36  ;;  %v1373_v4 = vpop.f32.mrb[45].mxu0  ;;  %v2757_v6 = vpop.f32.mrb[45].mxu1 }
 0x2b9   :  { %v2355_v7 = vpack.c.bf16 %v1373_v4, %v1371_v34  ;;  %v1375_v8 = vpop.f32.mrb[46].mxu0  ;;  %v1415_v9 = vpop.f32.mrb[46].mxu1 }
 0x2ba   :  { %1433 = vst [vmem:[#allocation2 + $0x8c] sm:$0xf] %v2356_v3  ;;  %v1376_v12 = vpop.f32.mrb[47].mxu0  ;;  %v2758_v37 = vpop.f32.mrb[47].mxu1 }
 0x2bb   :  { %1432 = vst [vmem:[#allocation2 + $0x84] sm:$0xff] %v2355_v7 }
 0x2d7   :  { %v1475_v25 = vpop.f32.mrb[48].mxu0  ;;  %v1516_v26 = vpop.f32.mrb[48].mxu1 }
 0x2d8   :  { %v2358_v27 = vpack.c.bf16 %v1516_v26, %v1516_v26  ;;  %v1477_v28 = vpop.f32.mrb[49].mxu0  ;;  %v2777_v29 = vpop.f32.mrb[49].mxu1 }
 0x2d9   :  { %v2357_v30 = vpack.c.bf16 %v1477_v28, %v1475_v25  ;;  %v1479_v60 = vpop.f32.mrb[50].mxu0  ;;  %v1519_v61 = vpop.f32.mrb[50].mxu1 }
 0x2da   :  { %1537 = vst [vmem:[#allocation2 + $0x98] sm:$0xf] %v2358_v27  ;;  %v1480_v5 = vpop.f32.mrb[51].mxu0  ;;  %v2778_v35 = vpop.f32.mrb[51].mxu1 }
 0x2db   :  { %1536 = vst [vmem:[#allocation2 + $0x90] sm:$0xff] %v2357_v30 }
 0x2f7   :  { %v1579_v63 = vpop.f32.mrb[52].mxu0  ;;  %v1620_v0 = vpop.f32.mrb[52].mxu1 }
 0x2f8   :  { %v2360_v2 = vpack.c.bf16 %v1620_v0, %v1620_v0  ;;  %v1581_v10 = vpop.f32.mrb[53].mxu0  ;;  %v2797_v11 = vpop.f32.mrb[53].mxu1  ;;  %v4145_v0 = vmov (!%p2305_p0), 0.0  }
 0x2f9   :  { %v2359_v16 = vpack.c.bf16 %v1581_v10, %v1579_v63  ;;  %v1583_v31 = vpop.f32.mrb[54].mxu0  ;;  %v1623_v38 = vpop.f32.mrb[54].mxu1  ;;  %v4143_v63 = vmov 0.0  }
 0x2fa   :  { %1641 = vst [vmem:[#allocation2 + $0xa4] sm:$0xf] %v2360_v2  ;;  %v1584_v32 = vpop.f32.mrb[55].mxu0  ;;  %v2798_v33 = vpop.f32.mrb[55].mxu1 }
 0x2fb   :  { %1640 = vst [vmem:[#allocation2 + $0x9c] sm:$0xff] %v2359_v16 }
 0x317   :  { %v1683_v34 = vpop.f32.mrb[56].mxu0  ;;  %v1724_v36 = vpop.f32.mrb[56].mxu1 }
 0x318   :  { %v2362_v3 = vpack.c.bf16 %v1724_v36, %v1724_v36  ;;  %v1685_v4 = vpop.f32.mrb[57].mxu0  ;;  %v2817_v6 = vpop.f32.mrb[57].mxu1 }
 0x319   :  { %v2361_v7 = vpack.c.bf16 %v1685_v4, %v1683_v34  ;;  %v1687_v8 = vpop.f32.mrb[58].mxu0  ;;  %v1727_v9 = vpop.f32.mrb[58].mxu1 }
 0x31a   :  { %1745 = vst [vmem:[#allocation2 + $0xb0] sm:$0xf] %v2362_v3  ;;  %v1688_v12 = vpop.f32.mrb[59].mxu0  ;;  %v2818_v37 = vpop.f32.mrb[59].mxu1 }
 0x31b   :  { %1744 = vst [vmem:[#allocation2 + $0xa8] sm:$0xff] %v2361_v7 }
 0x335   :  { %2163 = sbr.rel (%p2305_p0) target bundleno = 1125 (0x465), region = 57 }
 0x337   :  { %v1787_v25 = vpop.f32.mrb[60].mxu0  ;;  %v1828_v26 = vpop.f32.mrb[60].mxu1 }
 0x338   :  { %v2364_v27 = vpack.c.bf16 %v1828_v26, %v1828_v26  ;;  %v1789_v28 = vpop.f32.mrb[61].mxu0  ;;  %v2837_v29 = vpop.f32.mrb[61].mxu1 }
 0x339   :  { %v2363_v30 = vpack.c.bf16 %v1789_v28, %v1787_v25  ;;  %v1791_v60 = vpop.f32.mrb[62].mxu0  ;;  %v1831_v61 = vpop.f32.mrb[62].mxu1 }
 0x33a   :  { %1849 = vst [vmem:[#allocation2 + $0xbc] sm:$0xf] %v2364_v27  ;;  %v1792_v5 = vpop.f32.mrb[63].mxu0  ;;  %v2838_v35 = vpop.f32.mrb[63].mxu1 }
 0x33b   :  { %1848 = vst [vmem:[#allocation2 + $0xb4] sm:$0xff] %v2363_v30 }
 0x33c LB: > { %v2308_v2 = vcombine.high %v3978_v40, %v3988_v13  ;;  %v2307_v10 = vcombine.low %v3978_v40, %v3988_v13  ;;  %v2311_v11 = vcombine.high %v3998_v15, %v4008_v50  ;;  %v2310_v16 = vcombine.low %v3998_v15, %v4008_v50  ;;  %s2365_s7 = smul.u32 12, %s3032_s30  ;;  %s3032_s30 = sphi %s4147_s30, %s1897_s30   ;;  %v3028_v0 = vphi %v4145_v0, %v4241_v0  }
 0x33d   : > { %v2309_v31 = vcombine.low %v3983_v41, %v3993_v14  ;;  %v2314_v38 = vcombine.high %v4018_v51, %v4028_v19  ;;  %v3057_v32 = vmov 0.0   ;;  %v2312_v33 = vcombine.low %v4003_v49, %v4013_v17 }
 0x33e   : > { %2038 = vmatprep.subr.bf16.mxu0 %v2308_v2  ;;  %2839 = vmatprep.subr.bf16.mxu1 %v3057_v32  ;;  %v3058_v34 = vmov 0   ;;  %v2313_v36 = vcombine.low %v4018_v51, %v4028_v19  ;;  %v2317_v3 = vcombine.high %v4038_v21, %v4048_v53  ;;  %vm3059_vm2 = vmmov 0   ;;  %s1903_s8 = scalar_lea.vmem [#allocation2], %s2365_s7 }
 0x33f   : > { %2039 = vmatpush1.bf16.msra.mxu0 %v2307_v10  ;;  %2840 = vmatpush3.bf16.msra.mxu1 %v2309_v31  ;;  %v2315_v4 = vcombine.low %v4023_v18, %v4033_v20  ;;  %v2316_v6 = vcombine.low %v4038_v21, %v4048_v53  ;;  %v2320_v7 = vcombine.high %v4058_v55, %v4068_v57 }
 0x340   : > { %2040 = vmatprep.subr.bf16.mxu0 %v2311_v11  ;;  %2070 = vmatprep.mubr.bf16.mxu0 %v3058_v34  ;;  %v2318_v8 = vcombine.low %v4043_v52, %v4053_v54  ;;  %v2319_v9 = vcombine.low %v4058_v55, %v4068_v57  ;;  %v2323_v12 = vcombine.high %v4078_v59, %v4088_v1 }
 0x341   : > { %2841 = vmatprep.subr.bf16.mxu1 %v3057_v32  ;;  %2855 = vmatprep.mubr.msk.bf16.mxu1 %vm3059_vm2, %v3057_v32  ;;  %v2321_v37 = vcombine.low %v4063_v56, %v4073_v58  ;;  %v2322_v25 = vcombine.low %v4078_v59, %v4088_v1  ;;  %v2326_v26 = vcombine.high %v4098_v43, %v4108_v45 }
 0x342   : > { %v2324_v27 = vcombine.low %v4083_v62, %v4093_v42  ;;  %v2325_v28 = vcombine.low %v4098_v43, %v4108_v45  ;;  %v2329_v29 = vcombine.high %v4118_v47, %v4128_v22  ;;  %v2327_v30 = vcombine.low %v4103_v44, %v4113_v46  ;;  %v1904_v35 = vld [vmem:[%s1903_s8] sm:$0xff] }
 0x343   : > { %2041 = vmatpush1.bf16.msra.mxu0 %v2310_v16  ;;  %2842 = vmatpush3.bf16.msra.mxu1 %v2312_v33  ;;  %v2328_v60 = vcombine.low %v4118_v47, %v4128_v22  ;;  %v2330_v61 = vcombine.low %v4123_v48, %v4133_v23  ;;  %v1909_v5 = vpack.c.bf16 %v3028_v0, %v3028_v0  ;;  %v1906_v63 = vunpack.c.l.bf16 %v1904_v35 }
 0x344   : > { %2042 = vmatprep.subr.bf16.mxu0 %v2314_v38  ;;  %2843 = vmatprep.subr.bf16.mxu1 %v3057_v32 }
 0x347   : > { %2043 = vmatpush1.bf16.msra.mxu0 %v2313_v36  ;;  %2844 = vmatpush3.bf16.msra.mxu1 %v2315_v4 }
 0x348   : > { %2044 = vmatprep.subr.bf16.mxu0 %v2317_v3  ;;  %2845 = vmatprep.subr.bf16.mxu1 %v3057_v32  ;;  %v1907_v3 = vunpack.c.h.bf16 %v1904_v35 }
 0x34b   : > { %2045 = vmatpush1.bf16.msra.mxu0 %v2316_v6  ;;  %2846 = vmatpush3.bf16.msra.mxu1 %v2318_v8 }
 0x34c   : > { %2046 = vmatprep.subr.bf16.mxu0 %v2320_v7  ;;  %2847 = vmatprep.subr.bf16.mxu1 %v3057_v32 }
 0x34f   : > { %2047 = vmatpush1.bf16.msra.mxu0 %v2319_v9  ;;  %2848 = vmatpush3.bf16.msra.mxu1 %v2321_v37  ;;  %v1905_v9 = vld [vmem:[%s1903_s8 + $0x8] sm:$0xf] }
 0x350   : > { %2048 = vmatprep.subr.bf16.mxu0 %v2323_v12  ;;  %2849 = vmatprep.subr.bf16.mxu1 %v3057_v32 }
 0x353   : > { %2049 = vmatpush1.bf16.msra.mxu0 %v2322_v25  ;;  %2850 = vmatpush3.bf16.msra.mxu1 %v2324_v27  ;;  %v1908_v25 = vunpack.c.l.bf16 %v1905_v9 }
 0x354   : > { %2050 = vmatprep.subr.bf16.mxu0 %v2326_v26  ;;  %2851 = vmatprep.subr.bf16.mxu1 %v3057_v32 }
 0x357   : > { %2051 = vmatpush1.bf16.msra.mxu0 %v2325_v28  ;;  %2852 = vmatpush3.bf16.msra.mxu1 %v2327_v30 }
 0x358   : > { %2052 = vmatprep.subr.bf16.mxu0 %v2329_v29  ;;  %2853 = vmatprep.subr.bf16.mxu1 %v3057_v32 }
 0x35b   : > { %2053 = vmatpush1.bf16.msra.mxu0 %v2328_v60  ;;  %2854 = vmatpush3.bf16.msra.mxu1 %v2330_v61  ;;  %v2140_v60 = vstv %s3032_s30  ;;  %s1897_s30 = sadd.s32 1, %s3032_s30  }
 0x35c   : > { %vm2141_vm3 = vcmp.lt.s32.totalorder %v2140_v60, %v3973_v39  ;;  %p1896_p1 = scmp.ge.s32.totalorder %s1897_s30, %s4234_s0 }
 0x35e   : > { %2071 = vmatmul.mubr.bf16.vlgmr.msra.gmra.mrb[0].mxu0 %v1909_v5  ;;  %2856 = vmatmul.mubr.bf16.vlgmr.msra.gmra.mrb[0].mxu1 %v1909_v5 }
 0x431   : > { %v2072_v2 = vpop.f32.mrb[0].mxu0  ;;  %v2113_v31 = vpop.f32.mrb[0].mxu1 }
 0x432   : > { %v2119_v10 = vadd.f32 %v2072_v2, %v1906_v63  ;;  %v2074_v11 = vpop.f32.mrb[1].mxu0  ;;  %v2857_v34 = vpop.f32.mrb[1].mxu1  ;;  %v2133_v12 = vadd.f32 %v4138_v24, %v2113_v31 }
 0x433   : > { %v2076_v16 = vpop.f32.mrb[2].mxu0  ;;  %v2116_v36 = vpop.f32.mrb[2].mxu1  ;;  %v2126_v4 = vadd.f32 %v2074_v11, %v1907_v3 }
 0x434   : > { %v2331_v38 = vmul.f32 -1.442695, %v2119_v10  ;;  %v2077_v33 = vpop.f32.mrb[3].mxu0  ;;  %v2858_v32 = vpop.f32.mrb[3].mxu1 }
 0x435   : > { %v2332_v6 = vmul.f32 -1.442695, %v2126_v4 }
 0x436   : > { %2980 = vpow2.f32 %v2331_v38 }
 0x437   : > { %2982 = vpow2.f32 %v2332_v6 }
 0x440   : > { %v2981_v7 = vpop.eup %2980 }
 0x441   : > { %v2123_v8 = vadd.f32 1.0, %v2981_v7  ;;  %v2983_v37 = vpop.eup %2982 }
 0x442   : > { %v2130_v28 = vadd.f32 1.0, %v2983_v37 }
 0x443   : > { %2984 = vrcp.f32 %v2123_v8 }
 0x44d   : > { %v2985_v26 = vpop.eup %2984 }
 0x44e   : > { %v2134_v27 = vmul.f32 %v2985_v26, %v2133_v12 }
 0x450   : > { %v2135_v29 = vadd.f32 %v2134_v27, %v1908_v25 }
 0x452   : > { %2986 = vtanh.f32 %v2135_v29 }
 0x453   : > { %2988 = vrcp.f32 %v2130_v28 }
 0x45c   : > { %v2987_v30 = vpop.eup %2986 }
 0x45d   : > { %v2137_v61 = vsub.f32 %v3028_v0, %v2987_v30  ;;  %v2989_v5 = vpop.eup %2988 }
 0x45e   :  { %1899 = sbr.rel (!%p1896_p1) target bundleno = 828 (0x33c), region = 63 }
 0x45f   : > { %v2138_v35 = vmul.f32 %v2989_v5, %v2137_v61 }
 0x461   : > { %v2139_v63 = vadd.f32 %v2987_v30, %v2138_v35 }
 0x463   : > { %v2142_v2 = vsel %vm2141_vm3, %v2139_v63, %v3028_v0  }
 0x464   : > { %v4241_v0 = vmov %v2142_v2  ;;  %v4242_v63 = vmov (%p1896_p1), %v2142_v2 }
 0x465 PF:  { %2143 = vst [vmem:[#allocation5] sm:$0xff] %v3036_v63  ;;  %s3060_s11 = smov [#allocation5]   ;;  %v3036_v63 = vphi %v4143_v63, %v4242_v63  }
 0x466   :  { %s2150_s12 = sshll.u32 %s3060_s11, 4  ;;  %s2151_s12 = int_to_ptr.vmem [resolvable:$true] %s2150_s12 }
 0x467   :  { %s2990_s13 = scalar_lea.vmem %s2151_s12, 128  ;;  %p2995_p3 = scmp.lt.s32.totalorder %s2151_s12, %s2151_s12 }
 0x468   :  { %p2991_p2 = scmp.ne.s32.totalorder %s2151_s12, %s2990_s13  ;;  %p2996_p4 = scmp.lt.s32.totalorder %s2990_s13, %s2990_s13 }
 0x46a   :  { %p2997_p5 = por %p2996_p4, %p2995_p3 }
 0x46c   :  { %p2998_p6 = pnand %p2997_p5, %p2991_p2 }
 0x46e   :  { %3001 = shalt.err (!%p2998_p6)
}
 0x46f   :  { %s3002_s0 = scalar_lea.hbm %s4240_s6, 128 }
 0x470   :  { %p3003_p7 = scmp.ne.s32.totalorder %s4240_s6, %s3002_s0  ;;  %p3006_p8 = scmp.lt.u32.totalorder %s3002_s0, %s4240_s6 }
 0x472   :  { %p3008_p9 = pnand %p3006_p8, %p3003_p7 }
 0x474   :  { %3011 = shalt.err (!%p3008_p9)
}
 0x475   :  { %2153 = dma.vmem_to_hbm [thread:$0]  %s2151_s12, 128, %s4240_s6, [#allocation6]  }
 0x476   :  { %3024 = dma.done.wait [#allocation6], 128  }
 0x477   :  { %3025 = vsyncadd [#allocation6], 4294967168 }
 0x478   :  { %2157 = vsyncpa [#allocation6], 1 }

</bundles_post_ra>
